<compile_context>
chip_gen: v7x
topology: tpu7x:2x2x1
jax: 0.10.0
libtpu: 0.0.40
codegen_flags: <defaults>
</compile_context>

<pallas_src>
import functools

import numpy as np
import jax
import jax.numpy as jnp
from jax.experimental import pallas as pl
from jax.experimental.pallas import tpu as pltpu


# ---------------------------------------------------------------------------
# Small helpers
# ---------------------------------------------------------------------------
def _round_up(v, m):
    return ((int(v) + m - 1) // m) * m


def _device_kind():
    try:
        return (jax.devices()[0].device_kind or "").lower()
    except Exception:
        return ""


def _default_weight_dtype():
    kind = _device_kind()
    # v6e / v7x MXUs are bf16 engines; f32 operands take the slow multi-pass.
    if "v6" in kind or "v7" in kind:
        return jnp.bfloat16
    return jnp.float32


def _min_batch_tiles():
    # v7x has 2 TensorCores per chip: keep an even grid >= 2 so the
    # "parallel" batch axis is sharded across both cores.
    return 2 if "v7" in _device_kind() else 1


# ---------------------------------------------------------------------------
# Degree / mask construction (mirrors MaskedLinear._get_mask_and_degrees with
# random_mask=False, the default MADE configuration).
# ---------------------------------------------------------------------------
def _input_degrees(features: int) -> np.ndarray:
    return np.arange(1, features + 1)


def _hidden_mask_and_degrees(in_degrees: np.ndarray, out_features: int,
                             features: int):
    max_ = max(1, features - 1)
    min_ = min(1, features - 1)
    out_degrees = np.arange(out_features) % max_ + min_
    mask = (out_degrees[:, None] >= in_degrees[None, :]).astype(np.float32)
    return mask, out_degrees


def _output_mask(in_degrees: np.ndarray, out_features: int, features: int):
    multiplier = out_features // features
    # helper_functions.tile repeats each element `multiplier` times.
    out_degrees = np.repeat(_input_degrees(features), multiplier)
    mask = (out_degrees[:, None] > in_degrees[None, :]).astype(np.float32)
    return mask, out_degrees


# ---------------------------------------------------------------------------
# Pallas kernel: fused MADE forward
#   initial masked linear -> num_blocks masked residual blocks -> final layer
# Hidden-layer slab order: [2b] = block_b.linear_0, [2b+1] = block_b.linear_1
# ---------------------------------------------------------------------------
def made_kernel(x_ref, w0_ref, b0_ref, wh_ref, bh_ref, wf_ref, bf_ref,
                out_ref, *, num_blocks):
    cdt = w0_ref.dtype  # MXU operand dtype (f32 or bf16); accumulation is f32

    x = x_ref[...]

    # initial_layer (features -> hidden)
    h = jnp.dot(x.astype(cdt), w0_ref[...],
                preferred_element_type=jnp.float32) + b0_ref[...]

    # residual blocks:  h = h + L1(relu(L0(relu(h))))  (activations stay f32)
    for blk in range(num_blocks):
        t = jnp.maximum(h, 0.0)
        t = jnp.dot(t.astype(cdt), wh_ref[2 * blk],
                    preferred_element_type=jnp.float32) + bh_ref[2 * blk]
        t = jnp.maximum(t, 0.0)
        t = jnp.dot(t.astype(cdt), wh_ref[2 * blk + 1],
                    preferred_element_type=jnp.float32) + bh_ref[2 * blk + 1]
        h = h + t

    # final_layer (strict autoregressive mask); lane-dense store.
    out_ref[...] = (jnp.dot(h.astype(cdt), wf_ref[...],
                            preferred_element_type=jnp.float32)
                    + bf_ref[...]).astype(out_ref.dtype)


def made_forward(x, params, *, block_batch=512, weight_dtype=None):
    """x: (B, F) float32.  params: list of pre-masked, pre-transposed (W, b)
    in forward order: [initial, (blk0.l0, blk0.l1), ..., final]."""
    B, F = x.shape
    L = len(params)
    assert L >= 4 and (L - 2) % 2 == 0, "expect >=1 residual block"
    num_blocks = (L - 2) // 2
    H = params[0][0].shape[1]
    out_dim = params[-1][0].shape[1]

    if weight_dtype is None:
        weight_dtype = _default_weight_dtype()

    # Per-layer padded widths (lane-dense, no uniform max() inflation).
    # NOTE: if H grows past 128, rounding P_h to a multiple of 256 can better
    # fill the 256-wide MXU on v6e/v7x; at H<=128 it is irrelevant.
    P_h = _round_up(H, 128)
    P_out = _round_up(out_dim, 128)

    # --- batch tiling -------------------------------------------------------
    B8 = _round_up(B, 8)
    tb_cap = max(8, _round_up(block_batch, 8))   # enforce (8,128) sublane rule
    tb = min(tb_cap, B8)
    n_tiles = -(-B8 // tb)
    min_tiles = _min_batch_tiles()
    if min_tiles > 1 and (n_tiles < min_tiles or n_tiles % min_tiles):
        n_tiles = _round_up(max(n_tiles, min_tiles), min_tiles)
        tb = _round_up(-(-B8 // n_tiles), 8)
    Bp = tb * n_tiles

    # --- host-side packing (zero-padded, pre-masked, pre-transposed) --------
    w0 = np.zeros((F, P_h), np.float32)
    b0 = np.zeros((1, P_h), np.float32)
    w0[:, :H] = np.asarray(params[0][0], np.float32)
    b0[0, :H] = np.asarray(params[0][1], np.float32)

    wh = np.zeros((2 * num_blocks, P_h, P_h), np.float32)
    bh = np.zeros((2 * num_blocks, 1, P_h), np.float32)
    for i in range(2 * num_blocks):
        w, b = params[1 + i]
        w = np.asarray(w, np.float32)
        b = np.asarray(b, np.float32)
        wh[i, :w.shape[0], :w.shape[1]] = w
        bh[i, 0, :b.shape[0]] = b

    wf = np.zeros((P_h, P_out), np.float32)
    bf = np.zeros((1, P_out), np.float32)
    wf[:H, :out_dim] = np.asarray(params[-1][0], np.float32)
    bf[0, :out_dim] = np.asarray(params[-1][1], np.float32)

    w0 = jnp.asarray(w0, weight_dtype)
    wh = jnp.asarray(wh, weight_dtype)
    wf = jnp.asarray(wf, weight_dtype)
    b0 = jnp.asarray(b0)      # biases stay f32
    bh = jnp.asarray(bh)
    bf = jnp.asarray(bf)

    # Only the batch dimension is padded; the lane dim stays F so no inflated
    # (Bp, 128) copy of x is materialized in HBM.
    x_in = x if Bp == B else jnp.zeros((Bp, F), x.dtype).at[:B].set(x)

    itemsize = jnp.dtype(weight_dtype).itemsize
    cost = pl.CostEstimate(
        flops=2 * Bp * (F * P_h + 2 * num_blocks * P_h * P_h + P_h * P_out),
        transcendentals=0,
        bytes_accessed=(Bp * F * 4 + Bp * P_out * 4
                        + (w0.size + wh.size + wf.size) * itemsize
                        + (b0.size + bh.size + bf.size) * 4),
    )

    out = pl.pallas_call(
        functools.partial(made_kernel, num_blocks=num_blocks),
        out_shape=jax.ShapeDtypeStruct((Bp, P_out), jnp.float32),
        grid=(n_tiles,),
        in_specs=[
            pl.BlockSpec((tb, F), lambda i: (i, 0)),          # x (pipelined)
            pl.BlockSpec((F, P_h), lambda i: (0, 0)),         # initial W
            pl.BlockSpec((1, P_h), lambda i: (0, 0)),         # initial b
            pl.BlockSpec((2 * num_blocks, P_h, P_h),
                         lambda i: (0, 0, 0)),                # block Ws
            pl.BlockSpec((2 * num_blocks, 1, P_h),
                         lambda i: (0, 0, 0)),                # block bs
            pl.BlockSpec((P_h, P_out), lambda i: (0, 0)),     # final W
            pl.BlockSpec((1, P_out), lambda i: (0, 0)),       # final b
        ],
        out_specs=pl.BlockSpec((tb, P_out), lambda i: (i, 0)),
        compiler_params=pltpu.CompilerParams(
            dimension_semantics=("parallel",)),
        cost_estimate=cost,
    )(x_in, w0, b0, wh, bh, wf, bf)

    return out[:B, :out_dim]


# ---------------------------------------------------------------------------
# Parameter construction (deterministic, in-script) + pure-JAX reference.
# ---------------------------------------------------------------------------
def build_made_params(key, features, hidden_features, num_blocks=2,
                      output_multiplier=1):
    """Returns list of (W_masked_T, b) in forward order."""
    keys = jax.random.split(key, 2 + 4 * num_blocks + 2)
    ki = iter(range(len(keys)))

    def uniform(k, shape, bound):
        return jax.random.uniform(keys[k], shape, jnp.float32, -bound, bound)

    params = []

    # initial layer: (features -> hidden)
    in_deg = _input_degrees(features)
    mask0, deg0 = _hidden_mask_and_degrees(in_deg, hidden_features, features)
    bound = 1.0 / np.sqrt(features)
    w0 = uniform(next(ki), (hidden_features, features), bound)
    b0 = uniform(next(ki), (hidden_features,), bound)
    params.append(((w0 * jnp.asarray(mask0)).T, b0))

    prev_deg = deg0
    bound_h = 1.0 / np.sqrt(hidden_features)
    for _ in range(num_blocks):
        # linear_0
        mask_a, deg_a = _hidden_mask_and_degrees(prev_deg, hidden_features,
                                                 features)
        wa = uniform(next(ki), (hidden_features, hidden_features), bound_h)
        ba = uniform(next(ki), (hidden_features,), bound_h)
        params.append(((wa * jnp.asarray(mask_a)).T, ba))
        # linear_1 (zero_initialization -> small uniform)
        mask_b, deg_b = _hidden_mask_and_degrees(deg_a, hidden_features,
                                                 features)
        wb = uniform(next(ki), (hidden_features, hidden_features), 0.001)
        bb = uniform(next(ki), (hidden_features,), 0.001)
        params.append(((wb * jnp.asarray(mask_b)).T, bb))
        assert np.all(deg_b >= prev_deg)
        prev_deg = deg_b

    # final layer: (hidden -> features * output_multiplier), strict mask
    out_features = features * output_multiplier
    mask_f, _ = _output_mask(prev_deg, out_features, features)
    wf = uniform(next(ki), (out_features, hidden_features), bound_h)
    bf = uniform(next(ki), (out_features,), bound_h)
    params.append(((wf * jnp.asarray(mask_f)).T, bf))

    return params


def made_reference(x, params):
    """Plain-JAX reference of the same forward pass for verification."""
    num_blocks = (len(params) - 2) // 2
    w0, b0 = params[0]
    h = x @ w0 + b0
    for blk in range(num_blocks):
        wa, ba = params[1 + 2 * blk]
        wb, bb = params[2 + 2 * blk]
        t = jnp.maximum(h, 0.0) @ wa + ba
        t = jnp.maximum(t, 0.0) @ wb + bb
        h = h + t
    wf, bf = params[-1]
    return h @ wf + bf


# TODO(synk): context_features / dropout / batch_norm paths of the PyTorch
# module are disabled in the default MADE config and are not implemented here.

if __name__ == "__main__":
    FEATURES = 8
    HIDDEN = 32
    NUM_BLOCKS = 2
    OUTPUT_MULTIPLIER = 1
    BATCH = 256

    key = jax.random.PRNGKey(0)
    kx, kp = jax.random.split(key)
    x = jax.random.normal(kx, (BATCH, FEATURES), dtype=jnp.float32)

    params = build_made_params(kp, FEATURES, HIDDEN,
                               num_blocks=NUM_BLOCKS,
                               output_multiplier=OUTPUT_MULTIPLIER)

    ref = made_reference(x, params)

    # Exact path (f32 weights) -> matches the PyTorch-equivalent reference.
    out_f32 = jax.block_until_ready(
        made_forward(x, params, weight_dtype=jnp.float32))
    np.testing.assert_allclose(np.asarray(out_f32), np.asarray(ref),
                               rtol=1e-4, atol=1e-4)

    # Fast MXU path (bf16 weights, f32 accumulation) -> loose tolerance.
    out_bf16 = jax.block_until_ready(
        made_forward(x, params, weight_dtype=jnp.bfloat16))
    np.testing.assert_allclose(np.asarray(out_bf16), np.asarray(ref),
                               rtol=5e-2, atol=5e-2)

    print("KERNEL_OK")
</pallas_src>

<mosaic_0001>
module attributes {stable_mosaic.version = 11 : i64} {
  func.func @made_kernel(%arg0: i32, %arg1: memref<256x8xf32, #tpu.memory_space<vmem>>, %arg2: memref<8x128xf32, #tpu.memory_space<vmem>>, %arg3: memref<1x128xf32, #tpu.memory_space<vmem>>, %arg4: memref<4x128x128xf32, #tpu.memory_space<vmem>>, %arg5: memref<4x1x128xf32, #tpu.memory_space<vmem>>, %arg6: memref<128x128xf32, #tpu.memory_space<vmem>>, %arg7: memref<1x128xf32, #tpu.memory_space<vmem>>, %arg8: memref<256x128xf32, #tpu.memory_space<vmem>>) attributes {dimension_semantics = [#tpu.dimension_semantics<parallel>], iteration_bounds = array<i64: 1>, scalar_prefetch = 0 : i64, scratch_operands = 0 : i64, tpu.core_type = #tpu.core_type<tc>, window_params = [{transform_indices = @transform_0, window_bounds = array<i64: 256, 8>}, {pipeline_mode = #tpu.pipeline_mode<synchronous>, transform_indices = @transform_1, window_bounds = array<i64: 8, 128>}, {pipeline_mode = #tpu.pipeline_mode<synchronous>, transform_indices = @transform_2, window_bounds = array<i64: 1, 128>}, {pipeline_mode = #tpu.pipeline_mode<synchronous>, transform_indices = @transform_3, window_bounds = array<i64: 4, 128, 128>}, {pipeline_mode = #tpu.pipeline_mode<synchronous>, transform_indices = @transform_4, window_bounds = array<i64: 4, 1, 128>}, {pipeline_mode = #tpu.pipeline_mode<synchronous>, transform_indices = @transform_5, window_bounds = array<i64: 128, 128>}, {pipeline_mode = #tpu.pipeline_mode<synchronous>, transform_indices = @transform_6, window_bounds = array<i64: 1, 128>}, {transform_indices = @transform_7, window_bounds = array<i64: 256, 128>}]} {
    %c0 = arith.constant 0 : index
    %c0_0 = arith.constant 0 : index
    %0 = vector.load %arg1[%c0, %c0_0] : memref<256x8xf32, #tpu.memory_space<vmem>>, vector<256x8xf32>
    %c0_1 = arith.constant 0 : index
    %c0_2 = arith.constant 0 : index
    %1 = vector.load %arg2[%c0_1, %c0_2] : memref<8x128xf32, #tpu.memory_space<vmem>>, vector<8x128xf32>
    %cst = arith.constant dense<0.000000e+00> : vector<256x128xf32>
    %2 = tpu.matmul %0, %1, %cst {dimension_numbers = #tpu.dot_dimension_numbers<[1], [0], [0], [1], [0, 0, 1, 1], [], []>} : vector<256x8xf32>, vector<8x128xf32>, vector<256x128xf32> -> vector<256x128xf32>
    %c0_3 = arith.constant 0 : index
    %c0_4 = arith.constant 0 : index
    %3 = vector.load %arg3[%c0_3, %c0_4] : memref<1x128xf32, #tpu.memory_space<vmem>>, vector<1x128xf32>
    %4 = vector.broadcast %3 : vector<1x128xf32> to vector<256x128xf32>
    %5 = arith.addf %2, %4 : vector<256x128xf32>
    %cst_5 = arith.constant 0.000000e+00 : f32
    %6 = vector.broadcast %cst_5 : f32 to vector<256x128xf32>
    %7 = arith.maximumf %5, %6 : vector<256x128xf32>
    %c0_6 = arith.constant 0 : index
    %c0_7 = arith.constant 0 : index
    %c0_8 = arith.constant 0 : index
    %8 = vector.load %arg4[%c0_6, %c0_7, %c0_8] : memref<4x128x128xf32, #tpu.memory_space<vmem>>, vector<1x128x128xf32>
    %9 = vector.shape_cast %8 : vector<1x128x128xf32> to vector<128x128xf32>
    %cst_9 = arith.constant dense<0.000000e+00> : vector<256x128xf32>
    %10 = tpu.matmul %7, %9, %cst_9 {dimension_numbers = #tpu.dot_dimension_numbers<[1], [0], [0], [1], [0, 0, 1, 1], [], []>} : vector<256x128xf32>, vector<128x128xf32>, vector<256x128xf32> -> vector<256x128xf32>
    %c0_10 = arith.constant 0 : index
    %c0_11 = arith.constant 0 : index
    %c0_12 = arith.constant 0 : index
    %11 = vector.load %arg5[%c0_10, %c0_11, %c0_12] : memref<4x1x128xf32, #tpu.memory_space<vmem>>, vector<1x1x128xf32>
    %12 = vector.shape_cast %11 : vector<1x1x128xf32> to vector<1x128xf32>
    %13 = vector.broadcast %12 : vector<1x128xf32> to vector<256x128xf32>
    %14 = arith.addf %10, %13 : vector<256x128xf32>
    %cst_13 = arith.constant 0.000000e+00 : f32
    %15 = vector.broadcast %cst_13 : f32 to vector<256x128xf32>
    %16 = arith.maximumf %14, %15 : vector<256x128xf32>
    %c1 = arith.constant 1 : index
    %c0_14 = arith.constant 0 : index
    %c0_15 = arith.constant 0 : index
    %17 = vector.load %arg4[%c1, %c0_14, %c0_15] : memref<4x128x128xf32, #tpu.memory_space<vmem>>, vector<1x128x128xf32>
    %18 = vector.shape_cast %17 : vector<1x128x128xf32> to vector<128x128xf32>
    %cst_16 = arith.constant dense<0.000000e+00> : vector<256x128xf32>
    %19 = tpu.matmul %16, %18, %cst_16 {dimension_numbers = #tpu.dot_dimension_numbers<[1], [0], [0], [1], [0, 0, 1, 1], [], []>} : vector<256x128xf32>, vector<128x128xf32>, vector<256x128xf32> -> vector<256x128xf32>
    %c1_17 = arith.constant 1 : index
    %c0_18 = arith.constant 0 : index
    %c0_19 = arith.constant 0 : index
    %20 = vector.load %arg5[%c1_17, %c0_18, %c0_19] : memref<4x1x128xf32, #tpu.memory_space<vmem>>, vector<1x1x128xf32>
    %21 = vector.shape_cast %20 : vector<1x1x128xf32> to vector<1x128xf32>
    %22 = vector.broadcast %21 : vector<1x128xf32> to vector<256x128xf32>
    %23 = arith.addf %19, %22 : vector<256x128xf32>
    %24 = arith.addf %5, %23 : vector<256x128xf32>
    %cst_20 = arith.constant 0.000000e+00 : f32
    %25 = vector.broadcast %cst_20 : f32 to vector<256x128xf32>
    %26 = arith.maximumf %24, %25 : vector<256x128xf32>
    %c2 = arith.constant 2 : index
    %c0_21 = arith.constant 0 : index
    %c0_22 = arith.constant 0 : index
    %27 = vector.load %arg4[%c2, %c0_21, %c0_22] : memref<4x128x128xf32, #tpu.memory_space<vmem>>, vector<1x128x128xf32>
    %28 = vector.shape_cast %27 : vector<1x128x128xf32> to vector<128x128xf32>
    %cst_23 = arith.constant dense<0.000000e+00> : vector<256x128xf32>
    %29 = tpu.matmul %26, %28, %cst_23 {dimension_numbers = #tpu.dot_dimension_numbers<[1], [0], [0], [1], [0, 0, 1, 1], [], []>} : vector<256x128xf32>, vector<128x128xf32>, vector<256x128xf32> -> vector<256x128xf32>
    %c2_24 = arith.constant 2 : index
    %c0_25 = arith.constant 0 : index
    %c0_26 = arith.constant 0 : index
    %30 = vector.load %arg5[%c2_24, %c0_25, %c0_26] : memref<4x1x128xf32, #tpu.memory_space<vmem>>, vector<1x1x128xf32>
    %31 = vector.shape_cast %30 : vector<1x1x128xf32> to vector<1x128xf32>
    %32 = vector.broadcast %31 : vector<1x128xf32> to vector<256x128xf32>
    %33 = arith.addf %29, %32 : vector<256x128xf32>
    %cst_27 = arith.constant 0.000000e+00 : f32
    %34 = vector.broadcast %cst_27 : f32 to vector<256x128xf32>
    %35 = arith.maximumf %33, %34 : vector<256x128xf32>
    %c3 = arith.constant 3 : index
    %c0_28 = arith.constant 0 : index
    %c0_29 = arith.constant 0 : index
    %36 = vector.load %arg4[%c3, %c0_28, %c0_29] : memref<4x128x128xf32, #tpu.memory_space<vmem>>, vector<1x128x128xf32>
    %37 = vector.shape_cast %36 : vector<1x128x128xf32> to vector<128x128xf32>
    %cst_30 = arith.constant dense<0.000000e+00> : vector<256x128xf32>
    %38 = tpu.matmul %35, %37, %cst_30 {dimension_numbers = #tpu.dot_dimension_numbers<[1], [0], [0], [1], [0, 0, 1, 1], [], []>} : vector<256x128xf32>, vector<128x128xf32>, vector<256x128xf32> -> vector<256x128xf32>
    %c3_31 = arith.constant 3 : index
    %c0_32 = arith.constant 0 : index
    %c0_33 = arith.constant 0 : index
    %39 = vector.load %arg5[%c3_31, %c0_32, %c0_33] : memref<4x1x128xf32, #tpu.memory_space<vmem>>, vector<1x1x128xf32>
    %40 = vector.shape_cast %39 : vector<1x1x128xf32> to vector<1x128xf32>
    %41 = vector.broadcast %40 : vector<1x128xf32> to vector<256x128xf32>
    %42 = arith.addf %38, %41 : vector<256x128xf32>
    %43 = arith.addf %24, %42 : vector<256x128xf32>
    %c0_34 = arith.constant 0 : index
    %c0_35 = arith.constant 0 : index
    %44 = vector.load %arg6[%c0_34, %c0_35] : memref<128x128xf32, #tpu.memory_space<vmem>>, vector<128x128xf32>
    %cst_36 = arith.constant dense<0.000000e+00> : vector<256x128xf32>
    %45 = tpu.matmul %43, %44, %cst_36 {dimension_numbers = #tpu.dot_dimension_numbers<[1], [0], [0], [1], [0, 0, 1, 1], [], []>} : vector<256x128xf32>, vector<128x128xf32>, vector<256x128xf32> -> vector<256x128xf32>
    %c0_37 = arith.constant 0 : index
    %c0_38 = arith.constant 0 : index
    %46 = vector.load %arg7[%c0_37, %c0_38] : memref<1x128xf32, #tpu.memory_space<vmem>>, vector<1x128xf32>
    %47 = vector.broadcast %46 : vector<1x128xf32> to vector<256x128xf32>
    %48 = arith.addf %45, %47 : vector<256x128xf32>
    %c0_39 = arith.constant 0 : index
    %c0_40 = arith.constant 0 : index
    %49 = vector.load %arg8[%c0_39, %c0_40] : memref<256x128xf32, #tpu.memory_space<vmem>>, vector<256x128xf32>
    tpu.vector_store %arg8[%c0_39, %c0_40], %48 {strides = array<i32>} : memref<256x128xf32, #tpu.memory_space<vmem>>, vector<256x128xf32>,
    return
  }
  func.func @transform_0(%arg0: i32) -> (i32, i32) {
    %c0_i32 = arith.constant 0 : i32
    %c0_i32_0 = arith.constant 0 : i32
    return %arg0, %c0_i32 : i32, i32
  }
  func.func @transform_1(%arg0: i32) -> (i32, i32) {
    %c0_i32 = arith.constant 0 : i32
    %c0_i32_0 = arith.constant 0 : i32
    %c0_i32_1 = arith.constant 0 : i32
    return %c0_i32, %c0_i32_0 : i32, i32
  }
  func.func @transform_2(%arg0: i32) -> (i32, i32) {
    %c0_i32 = arith.constant 0 : i32
    %c0_i32_0 = arith.constant 0 : i32
    %c0_i32_1 = arith.constant 0 : i32
    return %c0_i32, %c0_i32_0 : i32, i32
  }
  func.func @transform_3(%arg0: i32) -> (i32, i32, i32) {
    %c0_i32 = arith.constant 0 : i32
    %c0_i32_0 = arith.constant 0 : i32
    %c0_i32_1 = arith.constant 0 : i32
    %c0_i32_2 = arith.constant 0 : i32
    return %c0_i32, %c0_i32_0, %c0_i32_1 : i32, i32, i32
  }
  func.func @transform_4(%arg0: i32) -> (i32, i32, i32) {
    %c0_i32 = arith.constant 0 : i32
    %c0_i32_0 = arith.constant 0 : i32
    %c0_i32_1 = arith.constant 0 : i32
    %c0_i32_2 = arith.constant 0 : i32
    return %c0_i32, %c0_i32_0, %c0_i32_1 : i32, i32, i32
  }
  func.func @transform_5(%arg0: i32) -> (i32, i32) {
    %c0_i32 = arith.constant 0 : i32
    %c0_i32_0 = arith.constant 0 : i32
    %c0_i32_1 = arith.constant 0 : i32
    return %c0_i32, %c0_i32_0 : i32, i32
  }
  func.func @transform_6(%arg0: i32) -> (i32, i32) {
    %c0_i32 = arith.constant 0 : i32
    %c0_i32_0 = arith.constant 0 : i32
    %c0_i32_1 = arith.constant 0 : i32
    return %c0_i32, %c0_i32_0 : i32, i32
  }
  func.func @transform_7(%arg0: i32) -> (i32, i32) {
    %c0_i32 = arith.constant 0 : i32
    %c0_i32_0 = arith.constant 0 : i32
    return %arg0, %c0_i32 : i32, i32
  }
}

</mosaic_0001>

<bundles_post_ra>
// kernel: tpu_custom_call.1
= control target key start
LH: loop header
LB: loop body
LE: loop exit
PB: predicated region body
PF: predicated region fallthrough
CT: control target
= control target key end

     0   :  { %12 = vsyncpa [#allocation3], 0  ;;  %s3637_s0 = inlined_call_operand.vmem [shape: f32[256,8], index: 0, kind: input, shape index: {}]   ;;  %s3638_s1 = inlined_call_operand.vmem [shape: f32[8,128], index: 1, kind: input, shape index: {}]   ;;  %s3639_s2 = inlined_call_operand.vmem [shape: f32[1,128], index: 2, kind: input, shape index: {}]   ;;  %s3640_s3 = inlined_call_operand.hbm [shape: f32[4,128,128], index: 3, kind: input, shape index: {}]   ;;  %s3641_s4 = inlined_call_operand.vmem [shape: f32[4,1,128], index: 4, kind: input, shape index: {}]   ;;  %s3642_s5 = inlined_call_operand.vmem [shape: f32[128,128], index: 5, kind: input, shape index: {}]   ;;  %s3643_s6 = inlined_call_operand.vmem [shape: f32[1,128], index: 6, kind: input, shape index: {}]   ;;  %s3644_s7 = inlined_call_operand.hbm [shape: f32[256,128], index: 7, kind: output, shape index: {}]  }
   0x1   :  { %13 = vsyncpa [#allocation4], 0  ;;  %s2882_s24 = smov [#allocation2]   ;;  %s2834_s28 = scalar_lea.hbm %s3640_s3, 8192 }
   0x2   :  { %s25_s25 = sshll.u32 %s2882_s24, 4  ;;  %p2835_p0 = scmp.ne.s32.totalorder %s3640_s3, %s2834_s28  ;;  %s26_s25 = int_to_ptr.vmem [resolvable:$true] %s25_s25 }
   0x3   :  { %p2838_p1 = scmp.lt.u32.totalorder %s2834_s28, %s3640_s3 }
   0x5   :  { %p2840_p2 = pnand %p2838_p1, %p2835_p0 }
   0x7   :  { %2843 = shalt.err (!%p2840_p2)
}
   0x8   :  { %s2844_s10 = scalar_lea.vmem %s26_s25, 8192  ;;  %p2849_p4 = scmp.lt.s32.totalorder %s26_s25, %s26_s25 }
   0x9   :  { %p2845_p3 = scmp.ne.s32.totalorder %s26_s25, %s2844_s10  ;;  %p2850_p5 = scmp.lt.s32.totalorder %s2844_s10, %s2844_s10 }
   0xb   :  { %p2851_p6 = por %p2850_p5, %p2849_p4 }
   0xd   :  { %p2852_p7 = pnand %p2851_p6, %p2845_p3 }
   0xf   :  { %2855 = shalt.err (!%p2852_p7)
}
  0x10   :  { %s2883_s11 = smov 128   ;;  %s2884_s12 = smov 8  }
  0x11   :  { %31 = dma.hbm_to_vmem [thread:$0]  %s3640_s3, 8192, %s26_s25, [#allocation3], %s2883_s11, %s2883_s11, %s2884_s12  }
  0x12   :  { %2878 = dma.done.wait [#allocation3], 8192  }
  0x13   :  { %2879 = vsyncadd [#allocation3], 4294959104  ;;  %vm81_vm0 = vcmask 64512   ;;  %v73_v0 = vld [vmem:[%s3638_s1] sm:$0xff]  ;;  %v42_v2 = vld [vmem:[%s3637_s0 + $0x8] sm:$0xff] }
  0x14   :  { %v41_v1 = vld [vmem:[%s3637_s0] sm:$0xff]  ;;  %2204 = vmatprep.subr.mxu0 %v73_v0  ;;  %v43_v3 = vld [vmem:[%s3637_s0 + $0x10] sm:$0xff]  ;;  %v44_v4 = vld [vmem:[%s3637_s0 + $0x18] sm:$0xff] }
  0x15   :  { %2206 = vmatprep.mubr.msk.f32.mxu0 %vm81_vm0, %v41_v1  ;;  %2205 = vmatpush3.msra.mxu0 %v73_v0  ;;  %v45_v5 = vld [vmem:[%s3637_s0 + $0x20] sm:$0xff]  ;;  %v46_v6 = vld [vmem:[%s3637_s0 + $0x28] sm:$0xff]  ;;  %v47_v7 = vld [vmem:[%s3637_s0 + $0x30] sm:$0xff] }
  0x16   :  { %2207 = vmatmul.mubr.msk.f32.vlgmr.msra.gmra.mrb[0].mxu0 %vm81_vm0, %v42_v2  ;;  %v435_v8 = vld [vmem:[#allocation2] sm:$0xff]  ;;  %v436_v9 = vld [vmem:[#allocation2 + $0x8] sm:$0xff]  ;;  %v437_v10 = vld [vmem:[#allocation2 + $0x10] sm:$0xff] }
  0x17   :  { %2209 = vmatprep.mubr.msk.f32.mxu0 %vm81_vm0, %v43_v3  ;;  %v48_v11 = vld [vmem:[%s3637_s0 + $0x38] sm:$0xff]  ;;  %v2654_v12 = vpack.c.bf16 %v436_v9, %v435_v8  ;;  %v49_v14 = vld [vmem:[%s3637_s0 + $0x40] sm:$0xff]  ;;  %v440_v17 = vld [vmem:[#allocation2 + $0x28] sm:$0xff] }
  0x18   :  { %v438_v13 = vld [vmem:[#allocation2 + $0x18] sm:$0xff]  ;;  %v439_v16 = vld [vmem:[#allocation2 + $0x20] sm:$0xff]  ;;  %v50_v18 = vld [vmem:[%s3637_s0 + $0x48] sm:$0xff] }
  0x19   :  { %v2658_v15 = vpack.c.bf16 %v438_v13, %v437_v10  ;;  %2655 = vmatprep.subr.bf16.mxu1 %v2654_v12  ;;  %v2662_v19 = vpack.c.bf16 %v440_v17, %v439_v16  ;;  %v51_v20 = vld [vmem:[%s3637_s0 + $0x50] sm:$0xff]  ;;  %v442_v22 = vld [vmem:[#allocation2 + $0x38] sm:$0xff]  ;;  %v53_v25 = vld [vmem:[%s3637_s0 + $0x60] sm:$0xff] }
  0x1a   :  { %2210 = vmatmul.mubr.msk.f32.gmra.mrb[2].mxu0 %vm81_vm0, %v44_v4  ;;  %2657 = vmatpush3.bf16.msra.mxu1 %v2654_v12  ;;  %v441_v21 = vld [vmem:[#allocation2 + $0x30] sm:$0xff]  ;;  %v52_v23 = vld [vmem:[%s3637_s0 + $0x58] sm:$0xff]  ;;  %v443_v26 = vld [vmem:[#allocation2 + $0x40] sm:$0xff] }
  0x1b   :  { %2212 = vmatprep.mubr.msk.f32.mxu0 %vm81_vm0, %v45_v5  ;;  %2659 = vmatprep.subr.bf16.mxu1 %v2658_v15  ;;  %v2666_v24 = vpack.c.bf16 %v442_v22, %v441_v21  ;;  %v444_v27 = vld [vmem:[#allocation2 + $0x48] sm:$0xff]  ;;  %v55_v30 = vld [vmem:[%s3637_s0 + $0x70] sm:$0xff]  ;;  %v446_v32 = vld [vmem:[#allocation2 + $0x58] sm:$0xff] }
  0x1c   :  { %v54_v28 = vld [vmem:[%s3637_s0 + $0x68] sm:$0xff]  ;;  %v2670_v29 = vpack.c.bf16 %v444_v27, %v443_v26  ;;  %v445_v31 = vld [vmem:[#allocation2 + $0x50] sm:$0xff]  ;;  %v56_v33 = vld [vmem:[%s3637_s0 + $0x78] sm:$0xff] }
  0x1d   :  { %v2674_v34 = vpack.c.bf16 %v446_v32, %v445_v31  ;;  %v57_v35 = vld [vmem:[%s3637_s0 + $0x80] sm:$0xff]  ;;  %v448_v37 = vld [vmem:[#allocation2 + $0x68] sm:$0xff]  ;;  %v59_v40 = vld [vmem:[%s3637_s0 + $0x90] sm:$0xff] }
  0x1e   :  { %2213 = vmatmul.mubr.msk.f32.gmra.mrb[4].mxu0 %vm81_vm0, %v46_v6  ;;  %2661 = vmatpush3.bf16.msra.mxu1 %v2658_v15  ;;  %v447_v36 = vld [vmem:[#allocation2 + $0x60] sm:$0xff]  ;;  %v58_v38 = vld [vmem:[%s3637_s0 + $0x88] sm:$0xff]  ;;  %v60_v41 = vld [vmem:[%s3637_s0 + $0x98] sm:$0xff] }
  0x1f   :  { %2215 = vmatprep.mubr.msk.f32.mxu0 %vm81_vm0, %v47_v7  ;;  %2663 = vmatprep.subr.bf16.mxu1 %v2662_v19  ;;  %v2678_v39 = vpack.c.bf16 %v448_v37, %v447_v36  ;;  %v61_v42 = vld [vmem:[%s3637_s0 + $0xa0] sm:$0xff]  ;;  %v62_v43 = vld [vmem:[%s3637_s0 + $0xa8] sm:$0xff]  ;;  %v63_v44 = vld [vmem:[%s3637_s0 + $0xb0] sm:$0xff] }
  0x20   :  { %v64_v45 = vld [vmem:[%s3637_s0 + $0xb8] sm:$0xff]  ;;  %v65_v46 = vld [vmem:[%s3637_s0 + $0xc0] sm:$0xff]  ;;  %v66_v47 = vld [vmem:[%s3637_s0 + $0xc8] sm:$0xff] }
  0x21   :  { %v67_v48 = vld [vmem:[%s3637_s0 + $0xd0] sm:$0xff]  ;;  %v68_v49 = vld [vmem:[%s3637_s0 + $0xd8] sm:$0xff]  ;;  %v69_v50 = vld [vmem:[%s3637_s0 + $0xe0] sm:$0xff] }
  0x22   :  { %2216 = vmatmul.mubr.msk.f32.gmra.mrb[6].mxu0 %vm81_vm0, %v48_v11  ;;  %2665 = vmatpush3.bf16.msra.mxu1 %v2662_v19  ;;  %v70_v51 = vld [vmem:[%s3637_s0 + $0xe8] sm:$0xff]  ;;  %v71_v52 = vld [vmem:[%s3637_s0 + $0xf0] sm:$0xff]  ;;  %v72_v53 = vld [vmem:[%s3637_s0 + $0xf8] sm:$0xff] }
  0x23   :  { %2218 = vmatprep.mubr.msk.f32.mxu0 %vm81_vm0, %v49_v14  ;;  %2667 = vmatprep.subr.bf16.mxu1 %v2666_v24  ;;  %v449_v54 = vld [vmem:[#allocation2 + $0x70] sm:$0xff]  ;;  %v450_v55 = vld [vmem:[#allocation2 + $0x78] sm:$0xff]  ;;  %v716_v57 = vld [vmem:[#allocation2 + $0x80] sm:$0xff] }
  0x24   :  { %v2682_v56 = vpack.c.bf16 %v450_v55, %v449_v54  ;;  %v717_v58 = vld [vmem:[#allocation2 + $0x88] sm:$0xff]  ;;  %v718_v59 = vld [vmem:[#allocation2 + $0x90] sm:$0xff]  ;;  %v719_v61 = vld [vmem:[#allocation2 + $0x98] sm:$0xff] }
  0x25   :  { %v2686_v60 = vpack.c.bf16 %v717_v58, %v716_v57  ;;  %v2690_v62 = vpack.c.bf16 %v719_v61, %v718_v59  ;;  %v720_v63 = vld [vmem:[#allocation2 + $0xa0] sm:$0xff]  ;;  %v721_v0 = vld [vmem:[#allocation2 + $0xa8] sm:$0xff]  ;;  %v722_v2 = vld [vmem:[#allocation2 + $0xb0] sm:$0xff] }
  0x26   :  { %2219 = vmatmul.mubr.msk.f32.gmra.mrb[8].mxu0 %vm81_vm0, %v50_v18  ;;  %2669 = vmatpush3.bf16.msra.mxu1 %v2666_v24  ;;  %v2694_v1 = vpack.c.bf16 %v721_v0, %v720_v63  ;;  %v723_v3 = vld [vmem:[#allocation2 + $0xb8] sm:$0xff]  ;;  %v724_v5 = vld [vmem:[#allocation2 + $0xc0] sm:$0xff]  ;;  %v725_v6 = vld [vmem:[#allocation2 + $0xc8] sm:$0xff] }
  0x27   :  { %2221 = vmatprep.mubr.msk.f32.mxu0 %vm81_vm0, %v51_v20  ;;  %2671 = vmatprep.subr.bf16.mxu1 %v2670_v29  ;;  %v2698_v4 = vpack.c.bf16 %v723_v3, %v722_v2  ;;  %v2702_v7 = vpack.c.bf16 %v725_v6, %v724_v5  ;;  %v726_v8 = vld [vmem:[#allocation2 + $0xd0] sm:$0xff]  ;;  %v727_v9 = vld [vmem:[#allocation2 + $0xd8] sm:$0xff]  ;;  %v728_v11 = vld [vmem:[#allocation2 + $0xe0] sm:$0xff] }
  0x28   :  { %2687 = vmatprep.subr.bf16.mxu0 %v2686_v60  ;;  %v2706_v10 = vpack.c.bf16 %v727_v9, %v726_v8  ;;  %v729_v12 = vld [vmem:[#allocation2 + $0xe8] sm:$0xff]  ;;  %v730_v14 = vld [vmem:[#allocation2 + $0xf0] sm:$0xff]  ;;  %v731_v15 = vld [vmem:[#allocation2 + $0xf8] sm:$0xff] }
  0x29   :  { %2689 = vmatpush3.bf16.msra.mxu0 %v2686_v60  ;;  %v2710_v13 = vpack.c.bf16 %v729_v12, %v728_v11  ;;  %v2714_v16 = vpack.c.bf16 %v731_v15, %v730_v14  ;;  %v3075_v17 = vld [vmem:[%s3639_s2] ss:$0 sm:$0xff] }
  0x2a   :  { %2222 = vmatmul.mubr.msk.f32.gmra.mrb[10].mxu0 %vm81_vm0, %v52_v23  ;;  %2673 = vmatpush3.bf16.msra.mxu1 %v2670_v29 }
  0x2b   :  { %2224 = vmatprep.mubr.msk.f32.mxu0 %vm81_vm0, %v53_v25  ;;  %2675 = vmatprep.subr.bf16.mxu1 %v2674_v34 }
  0x2c   :  { %2691 = vmatprep.subr.bf16.mxu0 %v2690_v62 }
  0x2d   :  { %2693 = vmatpush3.bf16.msra.mxu0 %v2690_v62 }
  0x2e   :  { %2225 = vmatmul.mubr.msk.f32.gmra.mrb[12].mxu0 %vm81_vm0, %v54_v28  ;;  %2677 = vmatpush3.bf16.msra.mxu1 %v2674_v34 }
  0x2f   :  { %2227 = vmatprep.mubr.msk.f32.mxu0 %vm81_vm0, %v55_v30  ;;  %2679 = vmatprep.subr.bf16.mxu1 %v2678_v39 }
  0x30   :  { %2695 = vmatprep.subr.bf16.mxu0 %v2694_v1 }
  0x31   :  { %2697 = vmatpush3.bf16.msra.mxu0 %v2694_v1 }
  0x32   :  { %2228 = vmatmul.mubr.msk.f32.gmra.mrb[14].mxu0 %vm81_vm0, %v56_v33  ;;  %2681 = vmatpush3.bf16.msra.mxu1 %v2678_v39 }
  0x33   :  { %2230 = vmatprep.mubr.msk.f32.mxu0 %vm81_vm0, %v57_v35  ;;  %2683 = vmatprep.subr.bf16.mxu1 %v2682_v56 }
  0x34   :  { %2699 = vmatprep.subr.bf16.mxu0 %v2698_v4 }
  0x35   :  { %2701 = vmatpush3.bf16.msra.mxu0 %v2698_v4 }
  0x36   :  { %2231 = vmatmul.mubr.msk.f32.gmra.mrb[16].mxu0 %vm81_vm0, %v58_v38  ;;  %2685 = vmatpush3.bf16.msra.mxu1 %v2682_v56 }
  0x37   :  { %2233 = vmatprep.mubr.msk.f32.mxu0 %vm81_vm0, %v59_v40  ;;  %2703 = vmatprep.subr.bf16.mxu0 %v2702_v7 }
  0x39   :  { %2705 = vmatpush3.bf16.msra.mxu0 %v2702_v7 }
  0x3a   :  { %2234 = vmatmul.mubr.msk.f32.gmra.mrb[18].mxu0 %vm81_vm0, %v60_v41  ;;  %2707 = vmatprep.subr.bf16.mxu0 %v2706_v10 }
  0x3b   :  { %2236 = vmatprep.mubr.msk.f32.mxu0 %vm81_vm0, %v61_v42 }
  0x3d   :  { %2709 = vmatpush3.bf16.msra.mxu0 %v2706_v10 }
  0x3e   :  { %2237 = vmatmul.mubr.msk.f32.gmra.mrb[20].mxu0 %vm81_vm0, %v62_v43  ;;  %2711 = vmatprep.subr.bf16.mxu0 %v2710_v13 }
  0x3f   :  { %2239 = vmatprep.mubr.msk.f32.mxu0 %vm81_vm0, %v63_v44 }
  0x41   :  { %2713 = vmatpush3.bf16.msra.mxu0 %v2710_v13 }
  0x42   :  { %2240 = vmatmul.mubr.msk.f32.gmra.mrb[22].mxu0 %vm81_vm0, %v64_v45  ;;  %2715 = vmatprep.subr.bf16.mxu0 %v2714_v16 }
  0x43   :  { %2242 = vmatprep.mubr.msk.f32.mxu0 %vm81_vm0, %v65_v46 }
  0x45   :  { %2717 = vmatpush3.bf16.msra.mxu0 %v2714_v16 }
  0x46   :  { %2243 = vmatmul.mubr.msk.f32.gmra.mrb[24].mxu0 %vm81_vm0, %v66_v47 }
  0x47   :  { %2245 = vmatprep.mubr.msk.f32.mxu0 %vm81_vm0, %v67_v48 }
  0x4a   :  { %2246 = vmatmul.mubr.msk.f32.gmra.mrb[26].mxu0 %vm81_vm0, %v68_v49 }
  0x4b   :  { %2248 = vmatprep.mubr.msk.f32.mxu0 %vm81_vm0, %v69_v50 }
  0x4e   :  { %2249 = vmatmul.mubr.msk.f32.gmra.mrb[28].mxu0 %vm81_vm0, %v70_v51 }
  0x4f   :  { %2251 = vmatprep.mubr.msk.f32.mxu0 %vm81_vm0, %v71_v52 }
  0x52   :  { %2252 = vmatmul.mubr.msk.f32.gmra.mrb[30].mxu0 %vm81_vm0, %v72_v53 }
  0xe9   :  { %v2208_v18 = vpop.f32.mrb[0].mxu0 }
  0xea   :  { %v3078_v19 = vadd.f32 %v2208_v18, %v3075_v17  ;;  %v244_v20 = vpop.f32.mrb[1].mxu0 }
  0xeb   :  { %v3081_v21 = vadd.f32 %v3075_v17, %v244_v20 }
  0xec   :  { %v404_v24 = vmax.f32 %v3078_v19, 0.0 }
  0xed   :  { %v2211_v22 = vpop.f32.mrb[2].mxu0  ;;  %v403_v23 = vmax.f32 %v3081_v21, 0.0 }
  0xee   :  { %v3086_v25 = vadd.f32 %v2211_v22, %v3075_v17  ;;  %v254_v26 = vpop.f32.mrb[3].mxu0 }
  0xef   :  { %v3089_v27 = vadd.f32 %v3075_v17, %v254_v26  ;;  %2286 = vmatprep.mubr.f32.mxu1 %v403_v23 }
  0xf0   :  { %2287 = vmatmul.mubr.f32.vlgmr.msra.gmra.mrb[0].mxu1 %v404_v24  ;;  %v406_v30 = vmax.f32 %v3086_v25, 0.0 }
  0xf1   :  { %v405_v28 = vmax.f32 %v3089_v27, 0.0  ;;  %v2214_v29 = vpop.f32.mrb[4].mxu0 }
  0xf2   :  { %v3094_v31 = vadd.f32 %v2214_v29, %v3075_v17  ;;  %v264_v32 = vpop.f32.mrb[5].mxu0 }
  0xf3   :  { %v3097_v33 = vadd.f32 %v3075_v17, %v264_v32  ;;  %2289 = vmatprep.mubr.f32.mxu1 %v405_v28 }
  0xf4   :  { %2290 = vmatmul.mubr.f32.gmra.mrb[2].mxu1 %v406_v30  ;;  %v408_v36 = vmax.f32 %v3094_v31, 0.0 }
  0xf5   :  { %v407_v34 = vmax.f32 %v3097_v33, 0.0  ;;  %v2217_v35 = vpop.f32.mrb[6].mxu0 }
  0xf6   :  { %v3102_v37 = vadd.f32 %v2217_v35, %v3075_v17  ;;  %v274_v38 = vpop.f32.mrb[7].mxu0 }
  0xf7   :  { %v3105_v39 = vadd.f32 %v3075_v17, %v274_v38  ;;  %2292 = vmatprep.mubr.f32.mxu1 %v407_v34 }
  0xf8   :  { %2293 = vmatmul.mubr.f32.gmra.mrb[4].mxu1 %v408_v36  ;;  %v410_v42 = vmax.f32 %v3102_v37, 0.0 }
  0xf9   :  { %v409_v40 = vmax.f32 %v3105_v39, 0.0  ;;  %v2220_v41 = vpop.f32.mrb[8].mxu0 }
  0xfa   :  { %v3110_v43 = vadd.f32 %v2220_v41, %v3075_v17  ;;  %v284_v44 = vpop.f32.mrb[9].mxu0 }
  0xfb   :  { %v3113_v45 = vadd.f32 %v3075_v17, %v284_v44  ;;  %2295 = vmatprep.mubr.f32.mxu1 %v409_v40 }
  0xfc   :  { %2296 = vmatmul.mubr.f32.gmra.mrb[6].mxu1 %v410_v42  ;;  %v412_v48 = vmax.f32 %v3110_v43, 0.0 }
  0xfd   :  { %v411_v46 = vmax.f32 %v3113_v45, 0.0  ;;  %v2223_v47 = vpop.f32.mrb[10].mxu0 }
  0xfe   :  { %v3118_v49 = vadd.f32 %v2223_v47, %v3075_v17  ;;  %v294_v50 = vpop.f32.mrb[11].mxu0 }
  0xff   :  { %v3121_v51 = vadd.f32 %v3075_v17, %v294_v50  ;;  %2298 = vmatprep.mubr.f32.mxu1 %v411_v46 }
 0x100   :  { %2299 = vmatmul.mubr.f32.gmra.mrb[8].mxu1 %v412_v48  ;;  %v414_v54 = vmax.f32 %v3118_v49, 0.0 }
 0x101   :  { %v413_v52 = vmax.f32 %v3121_v51, 0.0  ;;  %v2226_v53 = vpop.f32.mrb[12].mxu0 }
 0x102   :  { %v3126_v55 = vadd.f32 %v2226_v53, %v3075_v17  ;;  %v304_v56 = vpop.f32.mrb[13].mxu0 }
 0x103   :  { %v3129_v57 = vadd.f32 %v3075_v17, %v304_v56  ;;  %2301 = vmatprep.mubr.f32.mxu1 %v413_v52 }
 0x104   :  { %2302 = vmatmul.mubr.f32.gmra.mrb[10].mxu1 %v414_v54  ;;  %v416_v60 = vmax.f32 %v3126_v55, 0.0 }
 0x105   :  { %v415_v58 = vmax.f32 %v3129_v57, 0.0  ;;  %v2229_v59 = vpop.f32.mrb[14].mxu0 }
 0x106   :  { %v3134_v61 = vadd.f32 %v2229_v59, %v3075_v17  ;;  %v314_v62 = vpop.f32.mrb[15].mxu0 }
 0x107   :  { %v3137_v63 = vadd.f32 %v3075_v17, %v314_v62  ;;  %2304 = vmatprep.mubr.f32.mxu1 %v415_v58 }
 0x108   :  { %2305 = vmatmul.mubr.f32.gmra.mrb[12].mxu1 %v416_v60  ;;  %v418_v2 = vmax.f32 %v3134_v61, 0.0 }
 0x109   :  { %v417_v0 = vmax.f32 %v3137_v63, 0.0  ;;  %v2232_v1 = vpop.f32.mrb[16].mxu0 }
 0x10a   :  { %v3142_v3 = vadd.f32 %v2232_v1, %v3075_v17  ;;  %v324_v4 = vpop.f32.mrb[17].mxu0 }
 0x10b   :  { %v3145_v5 = vadd.f32 %v3075_v17, %v324_v4  ;;  %2307 = vmatprep.mubr.f32.mxu1 %v417_v0  ;;  %v1030_v4 = vld [vmem:[#allocation2 + $0x100] sm:$0xff] }
 0x10c   :  { %2308 = vmatmul.mubr.f32.gmra.mrb[14].mxu1 %v418_v2  ;;  %v420_v8 = vmax.f32 %v3142_v3, 0.0 }
 0x10d   :  { %v419_v6 = vmax.f32 %v3145_v5, 0.0  ;;  %v2235_v7 = vpop.f32.mrb[18].mxu0 }
 0x10e   :  { %v3150_v9 = vadd.f32 %v2235_v7, %v3075_v17  ;;  %v334_v10 = vpop.f32.mrb[19].mxu0  ;;  %v1032_v7 = vld [vmem:[#allocation2 + $0x110] sm:$0xff] }
 0x10f   :  { %v3153_v11 = vadd.f32 %v3075_v17, %v334_v10  ;;  %2310 = vmatprep.mubr.f32.mxu1 %v419_v6  ;;  %v1031_v6 = vld [vmem:[#allocation2 + $0x108] sm:$0xff]  ;;  %v1033_v10 = vld [vmem:[#allocation2 + $0x118] sm:$0xff] }
 0x110   :  { %2311 = vmatmul.mubr.f32.gmra.mrb[16].mxu1 %v420_v8  ;;  %v422_v14 = vmax.f32 %v3150_v9, 0.0  ;;  %v2718_v8 = vpack.c.bf16 %v1031_v6, %v1030_v4 }
 0x111   :  { %v421_v12 = vmax.f32 %v3153_v11, 0.0  ;;  %v2238_v13 = vpop.f32.mrb[20].mxu0 }
 0x112   :  { %v3158_v15 = vadd.f32 %v2238_v13, %v3075_v17  ;;  %v344_v16 = vpop.f32.mrb[21].mxu0  ;;  %v1034_v13 = vld [vmem:[#allocation2 + $0x120] sm:$0xff]  ;;  %2719 = vmatprep.subr.bf16.mxu1 %v2718_v8 }
 0x113   :  { %v3161_v18 = vadd.f32 %v3075_v17, %v344_v16  ;;  %2313 = vmatprep.mubr.f32.mxu1 %v421_v12  ;;  %v2722_v12 = vpack.c.bf16 %v1033_v10, %v1032_v7  ;;  %2721 = vmatpush3.bf16.msra.mxu1 %v2718_v8  ;;  %v1036_v16 = vld [vmem:[#allocation2 + $0x130] sm:$0xff] }
 0x114   :  { %2314 = vmatmul.mubr.f32.gmra.mrb[18].mxu1 %v422_v14  ;;  %v424_v23 = vmax.f32 %v3158_v15, 0.0  ;;  %v1035_v14 = vld [vmem:[#allocation2 + $0x128] sm:$0xff] }
 0x115   :  { %v423_v20 = vmax.f32 %v3161_v18, 0.0  ;;  %v2241_v22 = vpop.f32.mrb[22].mxu0  ;;  %2723 = vmatprep.subr.bf16.mxu1 %v2722_v12 }
 0x116   :  { %v3166_v24 = vadd.f32 %v2241_v22, %v3075_v17  ;;  %v354_v26 = vpop.f32.mrb[23].mxu0 }
 0x117   :  { %v3169_v28 = vadd.f32 %v3075_v17, %v354_v26  ;;  %2316 = vmatprep.mubr.f32.mxu1 %v423_v20  ;;  %v1037_v20 = vld [vmem:[#allocation2 + $0x138] sm:$0xff]  ;;  %2725 = vmatpush3.bf16.msra.mxu1 %v2722_v12  ;;  %v1039_v26 = vld [vmem:[#allocation2 + $0x148] sm:$0xff] }
 0x118   :  { %2317 = vmatmul.mubr.f32.gmra.mrb[20].mxu1 %v424_v23  ;;  %v426_v32 = vmax.f32 %v3166_v24, 0.0  ;;  %v2730_v22 = vpack.c.bf16 %v1037_v20, %v1036_v16  ;;  %v1038_v23 = vld [vmem:[#allocation2 + $0x140] sm:$0xff] }
 0x119   :  { %v425_v29 = vmax.f32 %v3169_v28, 0.0  ;;  %v2244_v30 = vpop.f32.mrb[24].mxu0 }
 0x11a   :  { %v3174_v34 = vadd.f32 %v2244_v30, %v3075_v17  ;;  %v364_v35 = vpop.f32.mrb[25].mxu0  ;;  %v1040_v30 = vld [vmem:[#allocation2 + $0x150] sm:$0xff] }
 0x11b   :  { %v3177_v36 = vadd.f32 %v3075_v17, %v364_v35  ;;  %2319 = vmatprep.mubr.f32.mxu1 %v425_v29  ;;  %v2734_v29 = vpack.c.bf16 %v1039_v26, %v1038_v23 }
 0x11c   :  { %2320 = vmatmul.mubr.f32.gmra.mrb[22].mxu1 %v426_v32  ;;  %v428_v41 = vmax.f32 %v3174_v34, 0.0  ;;  %v1041_v32 = vld [vmem:[#allocation2 + $0x158] sm:$0xff] }
 0x11d   :  { %v427_v38 = vmax.f32 %v3177_v36, 0.0  ;;  %v2247_v40 = vpop.f32.mrb[26].mxu0  ;;  %v2738_v35 = vpack.c.bf16 %v1041_v32, %v1040_v30 }
 0x11e   :  { %v3182_v42 = vadd.f32 %v2247_v40, %v3075_v17  ;;  %v374_v44 = vpop.f32.mrb[27].mxu0  ;;  %v1043_v40 = vld [vmem:[#allocation2 + $0x168] sm:$0xff] }
 0x11f   :  { %v3185_v46 = vadd.f32 %v3075_v17, %v374_v44  ;;  %2322 = vmatprep.mubr.f32.mxu1 %v427_v38  ;;  %v1042_v38 = vld [vmem:[#allocation2 + $0x160] sm:$0xff] }
 0x120   :  { %2323 = vmatmul.mubr.f32.gmra.mrb[24].mxu1 %v428_v41  ;;  %v430_v50 = vmax.f32 %v3182_v42, 0.0  ;;  %v2742_v41 = vpack.c.bf16 %v1043_v40, %v1042_v38  ;;  %v3208_v44 = vld [vmem:[%s3641_s4] ss:$0 sm:$0xff] }
 0x121   :  { %v429_v47 = vmax.f32 %v3185_v46, 0.0  ;;  %v2250_v48 = vpop.f32.mrb[28].mxu0 }
 0x122   :  { %v3190_v52 = vadd.f32 %v2250_v48, %v3075_v17  ;;  %v384_v53 = vpop.f32.mrb[29].mxu0 }
 0x123   :  { %v3193_v54 = vadd.f32 %v3075_v17, %v384_v53  ;;  %2325 = vmatprep.mubr.f32.mxu1 %v429_v47 }
 0x124   :  { %2326 = vmatmul.mubr.f32.gmra.mrb[26].mxu1 %v430_v50  ;;  %v432_v59 = vmax.f32 %v3190_v52, 0.0 }
 0x125   :  { %v431_v56 = vmax.f32 %v3193_v54, 0.0  ;;  %v2253_v58 = vpop.f32.mrb[30].mxu0 }
 0x126   :  { %v3198_v60 = vadd.f32 %v2253_v58, %v3075_v17  ;;  %v394_v62 = vpop.f32.mrb[31].mxu0 }
 0x127   :  { %v3201_v0 = vadd.f32 %v3075_v17, %v394_v62  ;;  %2328 = vmatprep.mubr.f32.mxu1 %v431_v56  ;;  %v2726_v17 = vpack.c.bf16 %v1035_v14, %v1034_v13 }
 0x128   :  { %2329 = vmatmul.mubr.f32.gmra.mrb[28].mxu1 %v432_v59  ;;  %v434_v2 = vmax.f32 %v3198_v60, 0.0 }
 0x129   :  { %v433_v1 = vmax.f32 %v3201_v0, 0.0  ;;  %2727 = vmatprep.subr.bf16.mxu1 %v2726_v17 }
 0x12a   :  { %2729 = vmatpush3.bf16.msra.mxu1 %v2726_v17 }
 0x12b   :  { %2331 = vmatprep.mubr.f32.mxu1 %v433_v1  ;;  %2731 = vmatprep.subr.bf16.mxu1 %v2730_v22 }
 0x12c   :  { %2332 = vmatmul.mubr.f32.gmra.mrb[30].mxu1 %v434_v2 }
 0x12e   :  { %2733 = vmatpush3.bf16.msra.mxu1 %v2730_v22 }
 0x12f   :  { %2735 = vmatprep.subr.bf16.mxu1 %v2734_v29 }
 0x132   :  { %2737 = vmatpush3.bf16.msra.mxu1 %v2734_v29 }
 0x133   :  { %2739 = vmatprep.subr.bf16.mxu1 %v2738_v35 }
 0x136   :  { %2741 = vmatpush3.bf16.msra.mxu1 %v2738_v35 }
 0x137   :  { %2743 = vmatprep.subr.bf16.mxu1 %v2742_v41 }
 0x13a   :  { %2745 = vmatpush3.bf16.msra.mxu1 %v2742_v41 }
 0x1c3   :  { %v2288_v47 = vpop.f32.mrb[0].mxu1 }
 0x1c4   :  { %v530_v48 = vadd.f32 %v2288_v47, %v3208_v44  ;;  %v524_v50 = vpop.f32.mrb[1].mxu1 }
 0x1c5   :  { %v525_v53 = vadd.f32 %v3208_v44, %v524_v50 }
 0x1c6   :  { %v684_v59 = vmax.f32 %v530_v48, 0.0 }
 0x1c7   :  { %v683_v56 = vmax.f32 %v525_v53, 0.0  ;;  %v2291_v58 = vpop.f32.mrb[2].mxu1 }
 0x1c8   :  { %v540_v62 = vadd.f32 %v2291_v58, %v3208_v44  ;;  %v534_v1 = vpop.f32.mrb[3].mxu1 }
 0x1c9   :  { %v535_v2 = vadd.f32 %v3208_v44, %v534_v1  ;;  %2366 = vmatprep.mubr.f32.mxu0 %v683_v56 }
 0x1ca   :  { %2367 = vmatmul.mubr.f32.vlgmr.msra.gmra.mrb[32].mxu0 %v684_v59  ;;  %v686_v7 = vmax.f32 %v540_v62, 0.0 }
 0x1cb   :  { %v685_v4 = vmax.f32 %v535_v2, 0.0  ;;  %v2294_v6 = vpop.f32.mrb[4].mxu1 }
 0x1cc   :  { %v550_v8 = vadd.f32 %v2294_v6, %v3208_v44  ;;  %v544_v10 = vpop.f32.mrb[5].mxu1 }
 0x1cd   :  { %v545_v12 = vadd.f32 %v3208_v44, %v544_v10  ;;  %2369 = vmatprep.mubr.f32.mxu0 %v685_v4 }
 0x1ce   :  { %2370 = vmatmul.mubr.f32.gmra.mrb[34].mxu0 %v686_v7  ;;  %v688_v17 = vmax.f32 %v550_v8, 0.0 }
 0x1cf   :  { %v687_v13 = vmax.f32 %v545_v12, 0.0  ;;  %v2297_v14 = vpop.f32.mrb[6].mxu1 }
 0x1d0   :  { %v560_v16 = vadd.f32 %v2297_v14, %v3208_v44  ;;  %v554_v20 = vpop.f32.mrb[7].mxu1 }
 0x1d1   :  { %v555_v22 = vadd.f32 %v3208_v44, %v554_v20  ;;  %2372 = vmatprep.mubr.f32.mxu0 %v687_v13 }
 0x1d2   :  { %2373 = vmatmul.mubr.f32.gmra.mrb[36].mxu0 %v688_v17  ;;  %v690_v29 = vmax.f32 %v560_v16, 0.0 }
 0x1d3   :  { %v689_v23 = vmax.f32 %v555_v22, 0.0  ;;  %v2300_v26 = vpop.f32.mrb[8].mxu1 }
 0x1d4   :  { %v570_v30 = vadd.f32 %v2300_v26, %v3208_v44  ;;  %v564_v32 = vpop.f32.mrb[9].mxu1 }
 0x1d5   :  { %v565_v35 = vadd.f32 %v3208_v44, %v564_v32  ;;  %2375 = vmatprep.mubr.f32.mxu0 %v689_v23 }
 0x1d6   :  { %2376 = vmatmul.mubr.f32.gmra.mrb[38].mxu0 %v690_v29  ;;  %v692_v41 = vmax.f32 %v570_v30, 0.0 }
 0x1d7   :  { %v691_v38 = vmax.f32 %v565_v35, 0.0  ;;  %v2303_v40 = vpop.f32.mrb[10].mxu1 }
 0x1d8   :  { %v580_v47 = vadd.f32 %v2303_v40, %v3208_v44  ;;  %v574_v48 = vpop.f32.mrb[11].mxu1 }
 0x1d9   :  { %v575_v50 = vadd.f32 %v3208_v44, %v574_v48  ;;  %2378 = vmatprep.mubr.f32.mxu0 %v691_v38 }
 0x1da   :  { %2379 = vmatmul.mubr.f32.gmra.mrb[40].mxu0 %v692_v41  ;;  %v694_v58 = vmax.f32 %v580_v47, 0.0 }
 0x1db   :  { %v693_v53 = vmax.f32 %v575_v50, 0.0  ;;  %v2306_v56 = vpop.f32.mrb[12].mxu1 }
 0x1dc   :  { %v590_v59 = vadd.f32 %v2306_v56, %v3208_v44  ;;  %v584_v62 = vpop.f32.mrb[13].mxu1 }
 0x1dd   :  { %v585_v1 = vadd.f32 %v3208_v44, %v584_v62  ;;  %2381 = vmatprep.mubr.f32.mxu0 %v693_v53 }
 0x1de   :  { %2382 = vmatmul.mubr.f32.gmra.mrb[42].mxu0 %v694_v58  ;;  %v696_v6 = vmax.f32 %v590_v59, 0.0 }
 0x1df   :  { %v695_v2 = vmax.f32 %v585_v1, 0.0  ;;  %v2309_v4 = vpop.f32.mrb[14].mxu1 }
 0x1e0   :  { %v600_v7 = vadd.f32 %v2309_v4, %v3208_v44  ;;  %v594_v8 = vpop.f32.mrb[15].mxu1 }
 0x1e1   :  { %v595_v10 = vadd.f32 %v3208_v44, %v594_v8  ;;  %2384 = vmatprep.mubr.f32.mxu0 %v695_v2 }
 0x1e2   :  { %2385 = vmatmul.mubr.f32.gmra.mrb[44].mxu0 %v696_v6  ;;  %v698_v14 = vmax.f32 %v600_v7, 0.0 }
 0x1e3   :  { %v697_v12 = vmax.f32 %v595_v10, 0.0  ;;  %v2312_v13 = vpop.f32.mrb[16].mxu1 }
 0x1e4   :  { %v610_v17 = vadd.f32 %v2312_v13, %v3208_v44  ;;  %v604_v16 = vpop.f32.mrb[17].mxu1 }
 0x1e5   :  { %v605_v20 = vadd.f32 %v3208_v44, %v604_v16  ;;  %2387 = vmatprep.mubr.f32.mxu0 %v697_v12 }
 0x1e6   :  { %2388 = vmatmul.mubr.f32.gmra.mrb[46].mxu0 %v698_v14  ;;  %v700_v26 = vmax.f32 %v610_v17, 0.0 }
 0x1e7   :  { %v699_v22 = vmax.f32 %v605_v20, 0.0  ;;  %v2315_v23 = vpop.f32.mrb[18].mxu1 }
 0x1e8   :  { %v620_v29 = vadd.f32 %v2315_v23, %v3208_v44  ;;  %v614_v30 = vpop.f32.mrb[19].mxu1 }
 0x1e9   :  { %v615_v32 = vadd.f32 %v3208_v44, %v614_v30  ;;  %2390 = vmatprep.mubr.f32.mxu0 %v699_v22 }
 0x1ea   :  { %2391 = vmatmul.mubr.f32.gmra.mrb[48].mxu0 %v700_v26  ;;  %v702_v40 = vmax.f32 %v620_v29, 0.0 }
 0x1eb   :  { %v701_v35 = vmax.f32 %v615_v32, 0.0  ;;  %v2318_v38 = vpop.f32.mrb[20].mxu1 }
 0x1ec   :  { %v630_v41 = vadd.f32 %v2318_v38, %v3208_v44  ;;  %v624_v47 = vpop.f32.mrb[21].mxu1 }
 0x1ed   :  { %v625_v48 = vadd.f32 %v3208_v44, %v624_v47  ;;  %2393 = vmatprep.mubr.f32.mxu0 %v701_v35 }
 0x1ee   :  { %2394 = vmatmul.mubr.f32.gmra.mrb[50].mxu0 %v702_v40  ;;  %v704_v56 = vmax.f32 %v630_v41, 0.0 }
 0x1ef   :  { %v703_v50 = vmax.f32 %v625_v48, 0.0  ;;  %v2321_v53 = vpop.f32.mrb[22].mxu1 }
 0x1f0   :  { %v640_v58 = vadd.f32 %v2321_v53, %v3208_v44  ;;  %v634_v59 = vpop.f32.mrb[23].mxu1  ;;  %v1044_v53 = vld [vmem:[#allocation2 + $0x170] sm:$0xff] }
 0x1f1   :  { %v635_v62 = vadd.f32 %v3208_v44, %v634_v59  ;;  %2396 = vmatprep.mubr.f32.mxu0 %v703_v50  ;;  %v1312_v59 = vld [vmem:[#allocation2 + $0x180] sm:$0xff] }
 0x1f2   :  { %2397 = vmatmul.mubr.f32.gmra.mrb[52].mxu0 %v704_v56  ;;  %v706_v4 = vmax.f32 %v640_v58, 0.0  ;;  %v1045_v56 = vld [vmem:[#allocation2 + $0x178] sm:$0xff] }
 0x1f3   :  { %v705_v1 = vmax.f32 %v635_v62, 0.0  ;;  %v2324_v2 = vpop.f32.mrb[24].mxu1  ;;  %v2746_v58 = vpack.c.bf16 %v1045_v56, %v1044_v53  ;;  %v1313_v62 = vld [vmem:[#allocation2 + $0x188] sm:$0xff] }
 0x1f4   :  { %v650_v6 = vadd.f32 %v2324_v2, %v3208_v44  ;;  %v644_v7 = vpop.f32.mrb[25].mxu1  ;;  %v2750_v2 = vpack.c.bf16 %v1313_v62, %v1312_v59 }
 0x1f5   :  { %v645_v8 = vadd.f32 %v3208_v44, %v644_v7  ;;  %2399 = vmatprep.mubr.f32.mxu0 %v705_v1  ;;  %2747 = vmatprep.subr.bf16.mxu1 %v2746_v58  ;;  %v1314_v1 = vld [vmem:[#allocation2 + $0x190] sm:$0xff]  ;;  %v1316_v7 = vld [vmem:[#allocation2 + $0x1a0] sm:$0xff] }
 0x1f6   :  { %2400 = vmatmul.mubr.f32.gmra.mrb[54].mxu0 %v706_v4  ;;  %v708_v13 = vmax.f32 %v650_v6, 0.0  ;;  %2749 = vmatpush3.bf16.msra.mxu1 %v2746_v58  ;;  %v1315_v4 = vld [vmem:[#allocation2 + $0x198] sm:$0xff] }
 0x1f7   :  { %v707_v10 = vmax.f32 %v645_v8, 0.0  ;;  %v2327_v12 = vpop.f32.mrb[26].mxu1  ;;  %v2754_v6 = vpack.c.bf16 %v1315_v4, %v1314_v1  ;;  %v1317_v8 = vld [vmem:[#allocation2 + $0x1a8] sm:$0xff]  ;;  %2751 = vmatprep.subr.bf16.mxu0 %v2750_v2 }
 0x1f8   :  { %v660_v14 = vadd.f32 %v2327_v12, %v3208_v44  ;;  %v654_v17 = vpop.f32.mrb[27].mxu1  ;;  %2753 = vmatpush3.bf16.msra.mxu0 %v2750_v2  ;;  %v1319_v12 = vld [vmem:[#allocation2 + $0x1b8] sm:$0xff] }
 0x1f9   :  { %v655_v16 = vadd.f32 %v3208_v44, %v654_v17  ;;  %2402 = vmatprep.mubr.f32.mxu0 %v707_v10  ;;  %2755 = vmatprep.subr.bf16.mxu0 %v2754_v6  ;;  %v1318_v10 = vld [vmem:[#allocation2 + $0x1b0] sm:$0xff]  ;;  %v1321_v17 = vld [vmem:[#allocation2 + $0x1c8] sm:$0xff] }
 0x1fa   :  { %2403 = vmatmul.mubr.f32.gmra.mrb[56].mxu0 %v708_v13  ;;  %v710_v23 = vmax.f32 %v660_v14, 0.0  ;;  %v2762_v13 = vpack.c.bf16 %v1319_v12, %v1318_v10  ;;  %v1320_v14 = vld [vmem:[#allocation2 + $0x1c0] sm:$0xff] }
 0x1fb   :  { %v709_v20 = vmax.f32 %v655_v16, 0.0  ;;  %v2330_v22 = vpop.f32.mrb[28].mxu1  ;;  %v2766_v16 = vpack.c.bf16 %v1321_v17, %v1320_v14 }
 0x1fc   :  { %v670_v26 = vadd.f32 %v2330_v22, %v3208_v44  ;;  %v664_v29 = vpop.f32.mrb[29].mxu1  ;;  %2757 = vmatpush3.bf16.msra.mxu0 %v2754_v6  ;;  %v1323_v22 = vld [vmem:[#allocation2 + $0x1d8] sm:$0xff] }
 0x1fd   :  { %v665_v30 = vadd.f32 %v3208_v44, %v664_v29  ;;  %2405 = vmatprep.mubr.f32.mxu0 %v709_v20  ;;  %v1322_v20 = vld [vmem:[#allocation2 + $0x1d0] sm:$0xff]  ;;  %v1325_v29 = vld [vmem:[#allocation2 + $0x1e8] sm:$0xff] }
 0x1fe   :  { %2406 = vmatmul.mubr.f32.gmra.mrb[58].mxu0 %v710_v23  ;;  %v712_v38 = vmax.f32 %v670_v26, 0.0  ;;  %v2770_v23 = vpack.c.bf16 %v1323_v22, %v1322_v20  ;;  %v1324_v26 = vld [vmem:[#allocation2 + $0x1e0] sm:$0xff] }
 0x1ff   :  { %v711_v32 = vmax.f32 %v665_v30, 0.0  ;;  %v2333_v35 = vpop.f32.mrb[30].mxu1  ;;  %v2774_v30 = vpack.c.bf16 %v1325_v29, %v1324_v26 }
 0x200   :  { %v680_v40 = vadd.f32 %v2333_v35, %v3208_v44  ;;  %v674_v41 = vpop.f32.mrb[31].mxu1  ;;  %v1327_v35 = vld [vmem:[#allocation2 + $0x1f8] sm:$0xff] }
 0x201   :  { %v675_v47 = vadd.f32 %v3208_v44, %v674_v41  ;;  %2408 = vmatprep.mubr.f32.mxu0 %v711_v32  ;;  %v2758_v44 = vpack.c.bf16 %v1317_v8, %v1316_v7  ;;  %v1326_v32 = vld [vmem:[#allocation2 + $0x1f0] sm:$0xff] }
 0x202   :  { %2409 = vmatmul.mubr.f32.gmra.mrb[60].mxu0 %v712_v38  ;;  %v714_v50 = vmax.f32 %v680_v40, 0.0  ;;  %v2778_v38 = vpack.c.bf16 %v1327_v35, %v1326_v32  ;;  %v3245_v40 = vld [vmem:[%s3641_s4 + $0x1] ss:$0 sm:$0xff] }
 0x203   :  { %v713_v48 = vmax.f32 %v675_v47, 0.0  ;;  %2759 = vmatprep.subr.bf16.mxu0 %v2758_v44 }
 0x204   :  { %2761 = vmatpush3.bf16.msra.mxu0 %v2758_v44 }
 0x205   :  { %2411 = vmatprep.mubr.f32.mxu0 %v713_v48  ;;  %2763 = vmatprep.subr.bf16.mxu0 %v2762_v13 }
 0x206   :  { %2412 = vmatmul.mubr.f32.gmra.mrb[62].mxu0 %v714_v50 }
 0x208   :  { %2765 = vmatpush3.bf16.msra.mxu0 %v2762_v13 }
 0x209   :  { %2767 = vmatprep.subr.bf16.mxu0 %v2766_v16 }
 0x20c   :  { %2769 = vmatpush3.bf16.msra.mxu0 %v2766_v16 }
 0x20d   :  { %2771 = vmatprep.subr.bf16.mxu0 %v2770_v23 }
 0x210   :  { %2773 = vmatpush3.bf16.msra.mxu0 %v2770_v23 }
 0x211   :  { %2775 = vmatprep.subr.bf16.mxu0 %v2774_v30 }
 0x214   :  { %2777 = vmatpush3.bf16.msra.mxu0 %v2774_v30 }
 0x215   :  { %2779 = vmatprep.subr.bf16.mxu0 %v2778_v38 }
 0x218   :  { %2781 = vmatpush3.bf16.msra.mxu0 %v2778_v38 }
 0x29d   :  { %v2368_v41 = vpop.f32.mrb[32].mxu0 }
 0x29e   :  { %v812_v47 = vadd.f32 %v2368_v41, %v3245_v40  ;;  %v806_v48 = vpop.f32.mrb[33].mxu0 }
 0x29f   :  { %v807_v50 = vadd.f32 %v3245_v40, %v806_v48 }
 0x2a0   :  { %v3250_v53 = vadd.f32 %v812_v47, %v3078_v19 }
 0x2a1   :  { %v3253_v56 = vadd.f32 %v807_v50, %v3081_v21  ;;  %v2371_v58 = vpop.f32.mrb[34].mxu0 }
 0x2a2   :  { %v822_v59 = vadd.f32 %v2371_v58, %v3245_v40  ;;  %v816_v62 = vpop.f32.mrb[35].mxu0  ;;  %v998_v4 = vmax.f32 %v3250_v53, 0.0 }
 0x2a3   :  { %v817_v1 = vadd.f32 %v3245_v40, %v816_v62  ;;  %v997_v2 = vmax.f32 %v3253_v56, 0.0 }
 0x2a4   :  { %v3260_v6 = vadd.f32 %v822_v59, %v3086_v25 }
 0x2a5   :  { %v3263_v7 = vadd.f32 %v817_v1, %v3089_v27  ;;  %v2374_v19 = vpop.f32.mrb[36].mxu0  ;;  %2446 = vmatprep.mubr.f32.mxu1 %v997_v2 }
 0x2a6   :  { %v832_v21 = vadd.f32 %v2374_v19, %v3245_v40  ;;  %v826_v8 = vpop.f32.mrb[37].mxu0  ;;  %2447 = vmatmul.mubr.f32.vlgmr.msra.gmra.mrb[32].mxu1 %v998_v4  ;;  %v1000_v13 = vmax.f32 %v3260_v6, 0.0 }
 0x2a7   :  { %v827_v44 = vadd.f32 %v3245_v40, %v826_v8  ;;  %v999_v10 = vmax.f32 %v3263_v7, 0.0 }
 0x2a8   :  { %v3269_v12 = vadd.f32 %v832_v21, %v3094_v31 }
 0x2a9   :  { %v3273_v25 = vadd.f32 %v827_v44, %v3097_v33  ;;  %v2377_v27 = vpop.f32.mrb[38].mxu0  ;;  %2449 = vmatprep.mubr.f32.mxu1 %v999_v10 }
 0x2aa   :  { %v842_v14 = vadd.f32 %v2377_v27, %v3245_v40  ;;  %v836_v17 = vpop.f32.mrb[39].mxu0  ;;  %2450 = vmatmul.mubr.f32.gmra.mrb[34].mxu1 %v1000_v13  ;;  %v1002_v31 = vmax.f32 %v3269_v12, 0.0 }
 0x2ab   :  { %v837_v16 = vadd.f32 %v3245_v40, %v836_v17  ;;  %v1001_v20 = vmax.f32 %v3273_v25, 0.0 }
 0x2ac   :  { %v3279_v22 = vadd.f32 %v842_v14, %v3102_v37 }
 0x2ad   :  { %v3283_v23 = vadd.f32 %v837_v16, %v3105_v39  ;;  %v2380_v33 = vpop.f32.mrb[40].mxu0  ;;  %2452 = vmatprep.mubr.f32.mxu1 %v1001_v20 }
 0x2ae   :  { %v852_v26 = vadd.f32 %v2380_v33, %v3245_v40  ;;  %v846_v29 = vpop.f32.mrb[41].mxu0  ;;  %2453 = vmatmul.mubr.f32.gmra.mrb[36].mxu1 %v1002_v31  ;;  %v1004_v37 = vmax.f32 %v3279_v22, 0.0 }
 0x2af   :  { %v847_v30 = vadd.f32 %v3245_v40, %v846_v29  ;;  %v1003_v32 = vmax.f32 %v3283_v23, 0.0 }
 0x2b0   :  { %v3289_v35 = vadd.f32 %v852_v26, %v3110_v43 }
 0x2b1   :  { %v3293_v38 = vadd.f32 %v847_v30, %v3113_v45  ;;  %v2383_v39 = vpop.f32.mrb[42].mxu0  ;;  %2455 = vmatprep.mubr.f32.mxu1 %v1003_v32 }
 0x2b2   :  { %v862_v41 = vadd.f32 %v2383_v39, %v3245_v40  ;;  %v856_v47 = vpop.f32.mrb[43].mxu0  ;;  %2456 = vmatmul.mubr.f32.gmra.mrb[38].mxu1 %v1004_v37  ;;  %v1006_v43 = vmax.f32 %v3289_v35, 0.0 }
 0x2b3   :  { %v857_v48 = vadd.f32 %v3245_v40, %v856_v47  ;;  %v1005_v50 = vmax.f32 %v3293_v38, 0.0 }
 0x2b4   :  { %v3299_v58 = vadd.f32 %v862_v41, %v3118_v49 }
 0x2b5   :  { %v3303_v59 = vadd.f32 %v857_v48, %v3121_v51  ;;  %v2386_v45 = vpop.f32.mrb[44].mxu0  ;;  %2458 = vmatprep.mubr.f32.mxu1 %v1005_v50 }
 0x2b6   :  { %v872_v62 = vadd.f32 %v2386_v45, %v3245_v40  ;;  %v866_v1 = vpop.f32.mrb[45].mxu0  ;;  %2459 = vmatmul.mubr.f32.gmra.mrb[40].mxu1 %v1006_v43  ;;  %v1008_v49 = vmax.f32 %v3299_v58, 0.0 }
 0x2b7   :  { %v867_v2 = vadd.f32 %v3245_v40, %v866_v1  ;;  %v1007_v4 = vmax.f32 %v3303_v59, 0.0 }
 0x2b8   :  { %v3309_v19 = vadd.f32 %v872_v62, %v3126_v55 }
 0x2b9   :  { %v3313_v21 = vadd.f32 %v867_v2, %v3129_v57  ;;  %v2389_v51 = vpop.f32.mrb[46].mxu0  ;;  %2461 = vmatprep.mubr.f32.mxu1 %v1007_v4 }
 0x2ba   :  { %v882_v8 = vadd.f32 %v2389_v51, %v3245_v40  ;;  %v876_v44 = vpop.f32.mrb[47].mxu0  ;;  %2462 = vmatmul.mubr.f32.gmra.mrb[42].mxu1 %v1008_v49  ;;  %v1010_v55 = vmax.f32 %v3309_v19, 0.0 }
 0x2bb   :  { %v877_v10 = vadd.f32 %v3245_v40, %v876_v44  ;;  %v1009_v13 = vmax.f32 %v3313_v21, 0.0 }
 0x2bc   :  { %v3319_v27 = vadd.f32 %v882_v8, %v3134_v61 }
 0x2bd   :  { %v3323_v14 = vadd.f32 %v877_v10, %v3137_v63  ;;  %v2392_v57 = vpop.f32.mrb[48].mxu0  ;;  %2464 = vmatprep.mubr.f32.mxu1 %v1009_v13 }
 0x2be   :  { %v892_v17 = vadd.f32 %v2392_v57, %v3245_v40  ;;  %v886_v16 = vpop.f32.mrb[49].mxu0  ;;  %2465 = vmatmul.mubr.f32.gmra.mrb[44].mxu1 %v1010_v55  ;;  %v1012_v61 = vmax.f32 %v3319_v27, 0.0 }
 0x2bf   :  { %v887_v20 = vadd.f32 %v3245_v40, %v886_v16  ;;  %v1011_v31 = vmax.f32 %v3323_v14, 0.0 }
 0x2c0   :  { %v3329_v33 = vadd.f32 %v892_v17, %v3142_v3 }
 0x2c1   :  { %v3333_v26 = vadd.f32 %v887_v20, %v3145_v5  ;;  %v2395_v63 = vpop.f32.mrb[50].mxu0  ;;  %2467 = vmatprep.mubr.f32.mxu1 %v1011_v31 }
 0x2c2   :  { %v902_v29 = vadd.f32 %v2395_v63, %v3245_v40  ;;  %v896_v30 = vpop.f32.mrb[51].mxu0  ;;  %2468 = vmatmul.mubr.f32.gmra.mrb[46].mxu1 %v1012_v61  ;;  %v1014_v3 = vmax.f32 %v3329_v33, 0.0 }
 0x2c3   :  { %v897_v32 = vadd.f32 %v3245_v40, %v896_v30  ;;  %v1013_v37 = vmax.f32 %v3333_v26, 0.0 }
 0x2c4   :  { %v3339_v39 = vadd.f32 %v902_v29, %v3150_v9 }
 0x2c5   :  { %v3343_v41 = vadd.f32 %v897_v32, %v3153_v11  ;;  %v2398_v5 = vpop.f32.mrb[52].mxu0  ;;  %2470 = vmatprep.mubr.f32.mxu1 %v1013_v37 }
 0x2c6   :  { %v912_v47 = vadd.f32 %v2398_v5, %v3245_v40  ;;  %v906_v48 = vpop.f32.mrb[53].mxu0  ;;  %2471 = vmatmul.mubr.f32.gmra.mrb[48].mxu1 %v1014_v3  ;;  %v1016_v9 = vmax.f32 %v3339_v39, 0.0 }
 0x2c7   :  { %v907_v50 = vadd.f32 %v3245_v40, %v906_v48  ;;  %v1015_v43 = vmax.f32 %v3343_v41, 0.0 }
 0x2c8   :  { %v3349_v45 = vadd.f32 %v912_v47, %v3158_v15 }
 0x2c9   :  { %v3353_v62 = vadd.f32 %v907_v50, %v3161_v18  ;;  %v2401_v11 = vpop.f32.mrb[54].mxu0  ;;  %2473 = vmatprep.mubr.f32.mxu1 %v1015_v43 }
 0x2ca   :  { %v922_v1 = vadd.f32 %v2401_v11, %v3245_v40  ;;  %v916_v2 = vpop.f32.mrb[55].mxu0  ;;  %2474 = vmatmul.mubr.f32.gmra.mrb[50].mxu1 %v1016_v9  ;;  %v1018_v15 = vmax.f32 %v3349_v45, 0.0 }
 0x2cb   :  { %v917_v4 = vadd.f32 %v3245_v40, %v916_v2  ;;  %v1017_v49 = vmax.f32 %v3353_v62, 0.0 }
 0x2cc   :  { %v3359_v51 = vadd.f32 %v922_v1, %v3166_v24 }
 0x2cd   :  { %v3363_v8 = vadd.f32 %v917_v4, %v3169_v28  ;;  %v2404_v18 = vpop.f32.mrb[56].mxu0  ;;  %2476 = vmatprep.mubr.f32.mxu1 %v1017_v49  ;;  %v1596_v49 = vld [vmem:[%s3642_s5 + $0x18] sm:$0xff] }
 0x2ce   :  { %v932_v44 = vadd.f32 %v2404_v18, %v3245_v40  ;;  %v926_v10 = vpop.f32.mrb[57].mxu0  ;;  %2477 = vmatmul.mubr.f32.gmra.mrb[52].mxu1 %v1018_v15  ;;  %v1020_v24 = vmax.f32 %v3359_v51, 0.0  ;;  %v1597_v18 = vld [vmem:[%s3642_s5 + $0x20] sm:$0xff] }
 0x2cf   :  { %v927_v13 = vadd.f32 %v3245_v40, %v926_v10  ;;  %v1019_v55 = vmax.f32 %v3363_v8, 0.0 }
 0x2d0   :  { %v3369_v57 = vadd.f32 %v932_v44, %v3174_v34  ;;  %v1598_v44 = vld [vmem:[%s3642_s5 + $0x28] sm:$0xff] }
 0x2d1   :  { %v3373_v17 = vadd.f32 %v927_v13, %v3177_v36  ;;  %v2407_v28 = vpop.f32.mrb[58].mxu0  ;;  %2479 = vmatprep.mubr.f32.mxu1 %v1019_v55  ;;  %v2790_v10 = vpack.c.bf16 %v1598_v44, %v1597_v18  ;;  %v1599_v13 = vld [vmem:[%s3642_s5 + $0x30] sm:$0xff]  ;;  %v1600_v55 = vld [vmem:[%s3642_s5 + $0x38] sm:$0xff] }
 0x2d2   :  { %v942_v16 = vadd.f32 %v2407_v28, %v3245_v40  ;;  %v936_v20 = vpop.f32.mrb[59].mxu0  ;;  %2480 = vmatmul.mubr.f32.gmra.mrb[54].mxu1 %v1020_v24  ;;  %v1022_v34 = vmax.f32 %v3369_v57, 0.0  ;;  %v3431_v24 = vpack.c.bf16 %v1600_v55, %v1599_v13  ;;  %v1601_v28 = vld [vmem:[%s3642_s5 + $0x40] sm:$0xff] }
 0x2d3   :  { %v937_v31 = vadd.f32 %v3245_v40, %v936_v20  ;;  %v1021_v61 = vmax.f32 %v3373_v17, 0.0 }
 0x2d4   :  { %v3379_v63 = vadd.f32 %v942_v16, %v3182_v42  ;;  %v1602_v16 = vld [vmem:[%s3642_s5 + $0x48] sm:$0xff] }
 0x2d5   :  { %v3383_v29 = vadd.f32 %v937_v31, %v3185_v46  ;;  %v2410_v36 = vpop.f32.mrb[60].mxu0  ;;  %2482 = vmatprep.mubr.f32.mxu1 %v1021_v61  ;;  %v3440_v20 = vpack.c.bf16 %v1602_v16, %v1601_v28  ;;  %v1603_v31 = vld [vmem:[%s3642_s5 + $0x50] sm:$0xff]  ;;  %v1604_v61 = vld [vmem:[%s3642_s5 + $0x58] sm:$0xff] }
 0x2d6   :  { %v952_v30 = vadd.f32 %v2410_v36, %v3245_v40  ;;  %v946_v32 = vpop.f32.mrb[61].mxu0  ;;  %2483 = vmatmul.mubr.f32.gmra.mrb[56].mxu1 %v1022_v34  ;;  %v1024_v42 = vmax.f32 %v3379_v63, 0.0  ;;  %v3450_v34 = vpack.c.bf16 %v1604_v61, %v1603_v31  ;;  %v1605_v36 = vld [vmem:[%s3642_s5 + $0x60] sm:$0xff] }
 0x2d7   :  { %v947_v37 = vadd.f32 %v3245_v40, %v946_v32  ;;  %v1023_v3 = vmax.f32 %v3383_v29, 0.0 }
 0x2d8   :  { %v3389_v5 = vadd.f32 %v952_v30, %v3190_v52  ;;  %v1606_v30 = vld [vmem:[%s3642_s5 + $0x68] sm:$0xff] }
 0x2d9   :  { %v3393_v47 = vadd.f32 %v947_v37, %v3193_v54  ;;  %v2413_v46 = vpop.f32.mrb[62].mxu0  ;;  %2485 = vmatprep.mubr.f32.mxu1 %v1023_v3  ;;  %v3460_v32 = vpack.c.bf16 %v1606_v30, %v1605_v36  ;;  %v3468_v37 = vld [vmem:[%s3641_s4 + $0x2] ss:$0 sm:$0xff] }
 0x2da   :  { %v962_v48 = vadd.f32 %v2413_v46, %v3245_v40  ;;  %v956_v50 = vpop.f32.mrb[63].mxu0  ;;  %2486 = vmatmul.mubr.f32.gmra.mrb[58].mxu1 %v1024_v42  ;;  %v1026_v52 = vmax.f32 %v3389_v5, 0.0 }
 0x2db   :  { %v957_v43 = vadd.f32 %v3245_v40, %v956_v50  ;;  %v1025_v9 = vmax.f32 %v3393_v47, 0.0  ;;  %v1593_v40 = vld [vmem:[%s3642_s5] sm:$0xff] }
 0x2dc   :  { %v3399_v11 = vadd.f32 %v962_v48, %v3198_v60  ;;  %v1594_v60 = vld [vmem:[%s3642_s5 + $0x8] sm:$0xff] }
 0x2dd   :  { %v3403_v1 = vadd.f32 %v957_v43, %v3201_v0  ;;  %2488 = vmatprep.mubr.f32.mxu1 %v1025_v9  ;;  %v1595_v0 = vld [vmem:[%s3642_s5 + $0x10] sm:$0xff]  ;;  %v2782_v4 = vpack.c.bf16 %v1594_v60, %v1593_v40 }
 0x2de   :  { %2489 = vmatmul.mubr.f32.gmra.mrb[60].mxu1 %v1026_v52  ;;  %v1028_v2 = vmax.f32 %v3399_v11, 0.0  ;;  %v2786_v15 = vpack.c.bf16 %v1596_v49, %v1595_v0 }
 0x2df   :  { %v1027_v54 = vmax.f32 %v3403_v1, 0.0  ;;  %2814 = vmatprep.subr.bf16.mxu1 %v2782_v4  ;;  %2783 = vmatprep.subr.bf16.mxu0 %v2782_v4 }
 0x2e0   :  { %2822 = vmatpush3.bf16.msra.mxu1 %v2782_v4 }
 0x2e1   :  { %2491 = vmatprep.mubr.f32.mxu1 %v1027_v54  ;;  %2815 = vmatprep.subr.bf16.mxu1 %v2786_v15 }
 0x2e2   :  { %2492 = vmatmul.mubr.f32.gmra.mrb[62].mxu1 %v1028_v2 }
 0x2e4   :  { %2823 = vmatpush3.bf16.msra.mxu1 %v2786_v15 }
 0x2e5   :  { %2816 = vmatprep.subr.bf16.mxu1 %v2790_v10 }
 0x2e8   :  { %2824 = vmatpush3.bf16.msra.mxu1 %v2790_v10 }
 0x2e9   :  { %2817 = vmatprep.subr.bf16.mxu1 %v3431_v24 }
 0x2ec   :  { %2825 = vmatpush3.bf16.msra.mxu1 %v3431_v24 }
 0x2ed   :  { %2818 = vmatprep.subr.bf16.mxu1 %v3440_v20 }
 0x2f0   :  { %2826 = vmatpush3.bf16.msra.mxu1 %v3440_v20 }
 0x2f1   :  { %2819 = vmatprep.subr.bf16.mxu1 %v3450_v34 }
 0x2f4   :  { %2827 = vmatpush3.bf16.msra.mxu1 %v3450_v34 }
 0x2f5   :  { %2820 = vmatprep.subr.bf16.mxu1 %v3460_v32 }
 0x2f8   :  { %2828 = vmatpush3.bf16.msra.mxu1 %v3460_v32 }
 0x379   :  { %v2448_v3 = vpop.f32.mrb[32].mxu1 }
 0x37a   :  { %v1126_v42 = vadd.f32 %v2448_v3, %v3468_v37  ;;  %v1120_v46 = vpop.f32.mrb[33].mxu1 }
 0x37b   :  { %v1121_v48 = vadd.f32 %v3468_v37, %v1120_v46 }
 0x37c   :  { %v1280_v9 = vmax.f32 %v1126_v42, 0.0 }
 0x37d   :  { %v1279_v50 = vmax.f32 %v1121_v48, 0.0  ;;  %v2451_v43 = vpop.f32.mrb[34].mxu1 }
 0x37e   :  { %v1136_v52 = vadd.f32 %v2451_v43, %v3468_v37  ;;  %v1130_v54 = vpop.f32.mrb[35].mxu1 }
 0x37f   :  { %v1131_v2 = vadd.f32 %v3468_v37, %v1130_v54  ;;  %2526 = vmatprep.mubr.f32.mxu0 %v1279_v50 }
 0x380   :  { %2527 = vmatmul.mubr.f32.vlgmr.msra.gmra.mrb[64].mxu0 %v1280_v9  ;;  %v1282_v0 = vmax.f32 %v1136_v52, 0.0 }
 0x381   :  { %v1281_v40 = vmax.f32 %v1131_v2, 0.0  ;;  %v2454_v60 = vpop.f32.mrb[36].mxu1  ;;  %2785 = vmatpush3.bf16.msra.mxu0 %v2782_v4 }
 0x382   :  { %v1146_v49 = vadd.f32 %v2454_v60, %v3468_v37  ;;  %v1140_v18 = vpop.f32.mrb[37].mxu1  ;;  %2787 = vmatprep.subr.bf16.mxu0 %v2786_v15 }
 0x383   :  { %v1141_v44 = vadd.f32 %v3468_v37, %v1140_v18  ;;  %2529 = vmatprep.mubr.f32.mxu0 %v1281_v40 }
 0x384   :  { %2530 = vmatmul.mubr.f32.gmra.mrb[66].mxu0 %v1282_v0  ;;  %v1284_v28 = vmax.f32 %v1146_v49, 0.0 }
 0x385   :  { %v1283_v13 = vmax.f32 %v1141_v44, 0.0  ;;  %v2457_v55 = vpop.f32.mrb[38].mxu1  ;;  %2789 = vmatpush3.bf16.msra.mxu0 %v2786_v15 }
 0x386   :  { %v1156_v16 = vadd.f32 %v2457_v55, %v3468_v37  ;;  %v1150_v31 = vpop.f32.mrb[39].mxu1  ;;  %2791 = vmatprep.subr.bf16.mxu0 %v2790_v10 }
 0x387   :  { %v1151_v61 = vadd.f32 %v3468_v37, %v1150_v31  ;;  %2532 = vmatprep.mubr.f32.mxu0 %v1283_v13 }
 0x388   :  { %2533 = vmatmul.mubr.f32.gmra.mrb[68].mxu0 %v1284_v28  ;;  %v1286_v30 = vmax.f32 %v1156_v16, 0.0 }
 0x389   :  { %v1285_v4 = vmax.f32 %v1151_v61, 0.0  ;;  %v2460_v36 = vpop.f32.mrb[40].mxu1  ;;  %2793 = vmatpush3.bf16.msra.mxu0 %v2790_v10 }
 0x38a   :  { %v1166_v3 = vadd.f32 %v2460_v36, %v3468_v37  ;;  %v1160_v42 = vpop.f32.mrb[41].mxu1  ;;  %2795 = vmatprep.subr.bf16.mxu0 %v3431_v24 }
 0x38b   :  { %v1161_v15 = vadd.f32 %v3468_v37, %v1160_v42  ;;  %2535 = vmatprep.mubr.f32.mxu0 %v1285_v4 }
 0x38c   :  { %2536 = vmatmul.mubr.f32.gmra.mrb[70].mxu0 %v1286_v30  ;;  %v1288_v50 = vmax.f32 %v1166_v3, 0.0 }
 0x38d   :  { %v1287_v46 = vmax.f32 %v1161_v15, 0.0  ;;  %v2463_v48 = vpop.f32.mrb[42].mxu1  ;;  %2797 = vmatpush3.bf16.msra.mxu0 %v3431_v24 }
 0x38e   :  { %v1176_v43 = vadd.f32 %v2463_v48, %v3468_v37  ;;  %v1170_v9 = vpop.f32.mrb[43].mxu1  ;;  %2799 = vmatprep.subr.bf16.mxu0 %v3440_v20 }
 0x38f   :  { %v1171_v10 = vadd.f32 %v3468_v37, %v1170_v9  ;;  %2538 = vmatprep.mubr.f32.mxu0 %v1287_v46 }
 0x390   :  { %2539 = vmatmul.mubr.f32.gmra.mrb[72].mxu0 %v1288_v50  ;;  %v1290_v2 = vmax.f32 %v1176_v43, 0.0 }
 0x391   :  { %v1289_v52 = vmax.f32 %v1171_v10, 0.0  ;;  %v2466_v54 = vpop.f32.mrb[44].mxu1  ;;  %2801 = vmatpush3.bf16.msra.mxu0 %v3440_v20 }
 0x392   :  { %v1186_v40 = vadd.f32 %v2466_v54, %v3468_v37  ;;  %v1180_v60 = vpop.f32.mrb[45].mxu1  ;;  %2803 = vmatprep.subr.bf16.mxu0 %v3450_v34 }
 0x393   :  { %v1181_v24 = vadd.f32 %v3468_v37, %v1180_v60  ;;  %2541 = vmatprep.mubr.f32.mxu0 %v1289_v52 }
 0x394   :  { %2542 = vmatmul.mubr.f32.gmra.mrb[74].mxu0 %v1290_v2  ;;  %v1292_v18 = vmax.f32 %v1186_v40, 0.0 }
 0x395   :  { %v1291_v0 = vmax.f32 %v1181_v24, 0.0  ;;  %v2469_v49 = vpop.f32.mrb[46].mxu1  ;;  %2805 = vmatpush3.bf16.msra.mxu0 %v3450_v34 }
 0x396   :  { %v1196_v44 = vadd.f32 %v2469_v49, %v3468_v37  ;;  %v1190_v13 = vpop.f32.mrb[47].mxu1  ;;  %2807 = vmatprep.subr.bf16.mxu0 %v3460_v32 }
 0x397   :  { %v1191_v20 = vadd.f32 %v3468_v37, %v1190_v13  ;;  %2544 = vmatprep.mubr.f32.mxu0 %v1291_v0 }
 0x398   :  { %2545 = vmatmul.mubr.f32.gmra.mrb[76].mxu0 %v1292_v18  ;;  %v1294_v16 = vmax.f32 %v1196_v44, 0.0 }
 0x399   :  { %v1293_v55 = vmax.f32 %v1191_v20, 0.0  ;;  %v2472_v28 = vpop.f32.mrb[48].mxu1  ;;  %2809 = vmatpush3.bf16.msra.mxu0 %v3460_v32 }
 0x39a   :  { %v1206_v31 = vadd.f32 %v2472_v28, %v3468_v37  ;;  %v1200_v61 = vpop.f32.mrb[49].mxu1 }
 0x39b   :  { %v1201_v34 = vadd.f32 %v3468_v37, %v1200_v61  ;;  %2547 = vmatprep.mubr.f32.mxu0 %v1293_v55 }
 0x39c   :  { %2548 = vmatmul.mubr.f32.gmra.mrb[78].mxu0 %v1294_v16  ;;  %v1296_v30 = vmax.f32 %v1206_v31, 0.0 }
 0x39d   :  { %v1295_v4 = vmax.f32 %v1201_v34, 0.0  ;;  %v2475_v36 = vpop.f32.mrb[50].mxu1 }
 0x39e   :  { %v1216_v3 = vadd.f32 %v2475_v36, %v3468_v37  ;;  %v1210_v42 = vpop.f32.mrb[51].mxu1 }
 0x39f   :  { %v1211_v15 = vadd.f32 %v3468_v37, %v1210_v42  ;;  %2550 = vmatprep.mubr.f32.mxu0 %v1295_v4 }
 0x3a0   :  { %2551 = vmatmul.mubr.f32.gmra.mrb[80].mxu0 %v1296_v30  ;;  %v1298_v48 = vmax.f32 %v1216_v3, 0.0 }
 0x3a1   :  { %v1297_v46 = vmax.f32 %v1211_v15, 0.0  ;;  %v2478_v32 = vpop.f32.mrb[52].mxu1 }
 0x3a2   :  { %v1226_v50 = vadd.f32 %v2478_v32, %v3468_v37  ;;  %v1220_v43 = vpop.f32.mrb[53].mxu1 }
 0x3a3   :  { %v1221_v9 = vadd.f32 %v3468_v37, %v1220_v43  ;;  %2553 = vmatprep.mubr.f32.mxu0 %v1297_v46 }
 0x3a4   :  { %2554 = vmatmul.mubr.f32.gmra.mrb[82].mxu0 %v1298_v48  ;;  %v1300_v54 = vmax.f32 %v1226_v50, 0.0 }
 0x3a5   :  { %v1299_v10 = vmax.f32 %v1221_v9, 0.0  ;;  %v2481_v52 = vpop.f32.mrb[54].mxu1 }
 0x3a6   :  { %v1236_v2 = vadd.f32 %v2481_v52, %v3468_v37  ;;  %v1230_v40 = vpop.f32.mrb[55].mxu1  ;;  %v1607_v52 = vld [vmem:[%s3642_s5 + $0x70] sm:$0xff] }
 0x3a7   :  { %v1231_v60 = vadd.f32 %v3468_v37, %v1230_v40  ;;  %2556 = vmatprep.mubr.f32.mxu0 %v1299_v10 }
 0x3a8   :  { %2557 = vmatmul.mubr.f32.gmra.mrb[84].mxu0 %v1300_v54  ;;  %v1302_v49 = vmax.f32 %v1236_v2, 0.0  ;;  %v1608_v54 = vld [vmem:[%s3642_s5 + $0x78] sm:$0xff] }
 0x3a9   :  { %v1301_v24 = vmax.f32 %v1231_v60, 0.0  ;;  %v2484_v0 = vpop.f32.mrb[56].mxu1  ;;  %v2810_v2 = vpack.c.bf16 %v1608_v54, %v1607_v52 }
 0x3aa   :  { %v1246_v18 = vadd.f32 %v2484_v0, %v3468_v37  ;;  %v1240_v44 = vpop.f32.mrb[57].mxu1 }
 0x3ab   :  { %v1241_v13 = vadd.f32 %v3468_v37, %v1240_v44  ;;  %2559 = vmatprep.mubr.f32.mxu0 %v1301_v24  ;;  %2811 = vmatprep.subr.bf16.mxu0 %v2810_v2 }
 0x3ac   :  { %2560 = vmatmul.mubr.f32.gmra.mrb[86].mxu0 %v1302_v49  ;;  %v1304_v28 = vmax.f32 %v1246_v18, 0.0  ;;  %2821 = vmatprep.subr.bf16.mxu1 %v2810_v2 }
 0x3ad   :  { %v1303_v20 = vmax.f32 %v1241_v13, 0.0  ;;  %v2487_v55 = vpop.f32.mrb[58].mxu1  ;;  %2813 = vmatpush3.bf16.msra.mxu0 %v2810_v2  ;;  %2829 = vmatpush3.bf16.msra.mxu1 %v2810_v2 }
 0x3ae   :  { %v1256_v16 = vadd.f32 %v2487_v55, %v3468_v37  ;;  %v1250_v31 = vpop.f32.mrb[59].mxu1 }
 0x3af   :  { %v1251_v61 = vadd.f32 %v3468_v37, %v1250_v31  ;;  %2562 = vmatprep.mubr.f32.mxu0 %v1303_v20 }
 0x3b0   :  { %2563 = vmatmul.mubr.f32.gmra.mrb[88].mxu0 %v1304_v28  ;;  %v1306_v36 = vmax.f32 %v1256_v16, 0.0 }
 0x3b1   :  { %v1305_v34 = vmax.f32 %v1251_v61, 0.0  ;;  %v2490_v4 = vpop.f32.mrb[60].mxu1 }
 0x3b2   :  { %v1266_v30 = vadd.f32 %v2490_v4, %v3468_v37  ;;  %v1260_v3 = vpop.f32.mrb[61].mxu1 }
 0x3b3   :  { %v1261_v42 = vadd.f32 %v3468_v37, %v1260_v3  ;;  %2565 = vmatprep.mubr.f32.mxu0 %v1305_v34 }
 0x3b4   :  { %2566 = vmatmul.mubr.f32.gmra.mrb[90].mxu0 %v1306_v36  ;;  %v1308_v32 = vmax.f32 %v1266_v30, 0.0 }
 0x3b5   :  { %v1307_v15 = vmax.f32 %v1261_v42, 0.0  ;;  %v2493_v46 = vpop.f32.mrb[62].mxu1 }
 0x3b6   :  { %v1276_v48 = vadd.f32 %v2493_v46, %v3468_v37  ;;  %v1270_v50 = vpop.f32.mrb[63].mxu1 }
 0x3b7   :  { %v1271_v43 = vadd.f32 %v3468_v37, %v1270_v50  ;;  %2568 = vmatprep.mubr.f32.mxu0 %v1307_v15  ;;  %v3519_v37 = vld [vmem:[%s3641_s4 + $0x3] ss:$0 sm:$0xff] }
 0x3b8   :  { %2569 = vmatmul.mubr.f32.gmra.mrb[92].mxu0 %v1308_v32  ;;  %v1310_v10 = vmax.f32 %v1276_v48, 0.0 }
 0x3b9   :  { %v1309_v9 = vmax.f32 %v1271_v43, 0.0 }
 0x3bb   :  { %2571 = vmatprep.mubr.f32.mxu0 %v1309_v9 }
 0x3bc   :  { %2572 = vmatmul.mubr.f32.gmra.mrb[94].mxu0 %v1310_v10 }
 0x453   :  { %v2528_v40 = vpop.f32.mrb[64].mxu0 }
 0x454   :  { %v1408_v60 = vadd.f32 %v2528_v40, %v3519_v37  ;;  %v1402_v24 = vpop.f32.mrb[65].mxu0 }
 0x455   :  { %v1403_v0 = vadd.f32 %v3519_v37, %v1402_v24 }
 0x456   :  { %v1562_v44 = vadd.f32 %v1408_v60, %v3250_v53 }
 0x457   :  { %v1561_v49 = vadd.f32 %v1403_v0, %v3253_v56  ;;  %v2531_v18 = vpop.f32.mrb[66].mxu0 }
 0x458   :  { %v1418_v13 = vadd.f32 %v2531_v18, %v3519_v37  ;;  %v1412_v20 = vpop.f32.mrb[67].mxu0 }
 0x459   :  { %v1413_v55 = vadd.f32 %v3519_v37, %v1412_v20  ;;  %2606 = vmatprep.mubr.f32.mxu0 %v1561_v49 }
 0x45a   :  { %2607 = vmatmul.mubr.f32.vlgmr.msra.gmra.mrb[96].mxu0 %v1562_v44  ;;  %v1564_v31 = vadd.f32 %v1418_v13, %v3260_v6 }
 0x45b   :  { %v1563_v28 = vadd.f32 %v1413_v55, %v3263_v7  ;;  %v2534_v16 = vpop.f32.mrb[68].mxu0 }
 0x45c   :  { %v1428_v61 = vadd.f32 %v2534_v16, %v3519_v37  ;;  %v1422_v34 = vpop.f32.mrb[69].mxu0 }
 0x45d   :  { %v1423_v56 = vadd.f32 %v3519_v37, %v1422_v34  ;;  %2609 = vmatprep.mubr.f32.mxu0 %v1563_v28 }
 0x45e   :  { %2610 = vmatmul.mubr.f32.gmra.mrb[98].mxu0 %v1564_v31  ;;  %v1566_v36 = vadd.f32 %v1428_v61, %v3269_v12 }
 0x45f   :  { %v1565_v53 = vadd.f32 %v1423_v56, %v3273_v25  ;;  %v2537_v4 = vpop.f32.mrb[70].mxu0 }
 0x460   :  { %v1438_v30 = vadd.f32 %v2537_v4, %v3519_v37  ;;  %v1432_v3 = vpop.f32.mrb[71].mxu0 }
 0x461   :  { %v1433_v7 = vadd.f32 %v3519_v37, %v1432_v3  ;;  %2612 = vmatprep.mubr.f32.mxu0 %v1565_v53 }
 0x462   :  { %2613 = vmatmul.mubr.f32.gmra.mrb[100].mxu0 %v1566_v36  ;;  %v1568_v15 = vadd.f32 %v1438_v30, %v3279_v22 }
 0x463   :  { %v1567_v6 = vadd.f32 %v1433_v7, %v3283_v23  ;;  %v2540_v42 = vpop.f32.mrb[72].mxu0 }
 0x464   :  { %v1448_v46 = vadd.f32 %v2540_v42, %v3519_v37  ;;  %v1442_v32 = vpop.f32.mrb[73].mxu0 }
 0x465   :  { %v1443_v25 = vadd.f32 %v3519_v37, %v1442_v32  ;;  %2615 = vmatprep.mubr.f32.mxu1 %v1567_v6 }
 0x466   :  { %2616 = vmatmul.mubr.f32.vlgmr.msra.gmra.mrb[64].mxu1 %v1568_v15  ;;  %v1570_v50 = vadd.f32 %v1448_v46, %v3289_v35 }
 0x467   :  { %v1569_v12 = vadd.f32 %v1443_v25, %v3293_v38  ;;  %v2543_v48 = vpop.f32.mrb[74].mxu0 }
 0x468   :  { %v1458_v43 = vadd.f32 %v2543_v48, %v3519_v37  ;;  %v1452_v9 = vpop.f32.mrb[75].mxu0 }
 0x469   :  { %v1453_v23 = vadd.f32 %v3519_v37, %v1452_v9  ;;  %2618 = vmatprep.mubr.f32.mxu1 %v1569_v12 }
 0x46a   :  { %2619 = vmatmul.mubr.f32.gmra.mrb[66].mxu1 %v1570_v50  ;;  %v1572_v52 = vadd.f32 %v1458_v43, %v3299_v58 }
 0x46b   :  { %v1571_v22 = vadd.f32 %v1453_v23, %v3303_v59  ;;  %v2546_v10 = vpop.f32.mrb[76].mxu0 }
 0x46c   :  { %v1468_v54 = vadd.f32 %v2546_v10, %v3519_v37  ;;  %v1462_v2 = vpop.f32.mrb[77].mxu0 }
 0x46d   :  { %v1463_v38 = vadd.f32 %v3519_v37, %v1462_v2  ;;  %2621 = vmatprep.mubr.f32.mxu1 %v1571_v22 }
 0x46e   :  { %2622 = vmatmul.mubr.f32.gmra.mrb[68].mxu1 %v1572_v52  ;;  %v1574_v60 = vadd.f32 %v1468_v54, %v3309_v19 }
 0x46f   :  { %v1573_v35 = vadd.f32 %v1463_v38, %v3313_v21  ;;  %v2549_v40 = vpop.f32.mrb[78].mxu0 }
 0x470   :  { %v1478_v24 = vadd.f32 %v2549_v40, %v3519_v37  ;;  %v1472_v0 = vpop.f32.mrb[79].mxu0 }
 0x471   :  { %v1473_v59 = vadd.f32 %v3519_v37, %v1472_v0  ;;  %2624 = vmatprep.mubr.f32.mxu1 %v1573_v35 }
 0x472   :  { %2625 = vmatmul.mubr.f32.gmra.mrb[70].mxu1 %v1574_v60  ;;  %v1576_v18 = vadd.f32 %v1478_v24, %v3319_v27 }
 0x473   :  { %v1575_v58 = vadd.f32 %v1473_v59, %v3323_v14  ;;  %v2552_v49 = vpop.f32.mrb[80].mxu0 }
 0x474   :  { %v1488_v44 = vadd.f32 %v2552_v49, %v3519_v37  ;;  %v1482_v13 = vpop.f32.mrb[81].mxu0 }
 0x475   :  { %v1483_v21 = vadd.f32 %v3519_v37, %v1482_v13  ;;  %2627 = vmatprep.mubr.f32.mxu1 %v1575_v58 }
 0x476   :  { %2628 = vmatmul.mubr.f32.gmra.mrb[72].mxu1 %v1576_v18  ;;  %v1578_v55 = vadd.f32 %v1488_v44, %v3329_v33 }
 0x477   :  { %v1577_v19 = vadd.f32 %v1483_v21, %v3333_v26  ;;  %v2555_v20 = vpop.f32.mrb[82].mxu0 }
 0x478   :  { %v1498_v28 = vadd.f32 %v2555_v20, %v3519_v37  ;;  %v1492_v16 = vpop.f32.mrb[83].mxu0 }
 0x479   :  { %v1493_v14 = vadd.f32 %v3519_v37, %v1492_v16  ;;  %2630 = vmatprep.mubr.f32.mxu1 %v1577_v19 }
 0x47a   :  { %2631 = vmatmul.mubr.f32.gmra.mrb[74].mxu1 %v1578_v55  ;;  %v1580_v61 = vadd.f32 %v1498_v28, %v3339_v39 }
 0x47b   :  { %v1579_v27 = vadd.f32 %v1493_v14, %v3343_v41  ;;  %v2558_v31 = vpop.f32.mrb[84].mxu0 }
 0x47c   :  { %v1508_v34 = vadd.f32 %v2558_v31, %v3519_v37  ;;  %v1502_v56 = vpop.f32.mrb[85].mxu0 }
 0x47d   :  { %v1503_v26 = vadd.f32 %v3519_v37, %v1502_v56  ;;  %2633 = vmatprep.mubr.f32.mxu1 %v1579_v27 }
 0x47e   :  { %2634 = vmatmul.mubr.f32.gmra.mrb[76].mxu1 %v1580_v61  ;;  %v1582_v4 = vadd.f32 %v1508_v34, %v3349_v45 }
 0x47f   :  { %v1581_v33 = vadd.f32 %v1503_v26, %v3353_v62  ;;  %v2561_v53 = vpop.f32.mrb[86].mxu0 }
 0x480   :  { %v1518_v36 = vadd.f32 %v2561_v53, %v3519_v37  ;;  %v1512_v30 = vpop.f32.mrb[87].mxu0 }
 0x481   :  { %v1513_v41 = vadd.f32 %v3519_v37, %v1512_v30  ;;  %2636 = vmatprep.mubr.f32.mxu1 %v1581_v33 }
 0x482   :  { %2637 = vmatmul.mubr.f32.gmra.mrb[78].mxu1 %v1582_v4  ;;  %v1584_v7 = vadd.f32 %v1518_v36, %v3359_v51 }
 0x483   :  { %v1583_v39 = vadd.f32 %v1513_v41, %v3363_v8  ;;  %v2564_v3 = vpop.f32.mrb[88].mxu0 }
 0x484   :  { %v1528_v6 = vadd.f32 %v2564_v3, %v3519_v37  ;;  %v1522_v42 = vpop.f32.mrb[89].mxu0 }
 0x485   :  { %v1523_v62 = vadd.f32 %v3519_v37, %v1522_v42  ;;  %2639 = vmatprep.mubr.f32.mxu1 %v1583_v39 }
 0x486   :  { %2640 = vmatmul.mubr.f32.gmra.mrb[80].mxu1 %v1584_v7  ;;  %v1586_v46 = vadd.f32 %v1528_v6, %v3369_v57 }
 0x487   :  { %v1585_v45 = vadd.f32 %v1523_v62, %v3373_v17  ;;  %v2567_v15 = vpop.f32.mrb[90].mxu0 }
 0x488   :  { %v1538_v32 = vadd.f32 %v2567_v15, %v3519_v37  ;;  %v1532_v25 = vpop.f32.mrb[91].mxu0 }
 0x489   :  { %v1533_v8 = vadd.f32 %v3519_v37, %v1532_v25  ;;  %2642 = vmatprep.mubr.f32.mxu1 %v1585_v45 }
 0x48a   :  { %2643 = vmatmul.mubr.f32.gmra.mrb[82].mxu1 %v1586_v46  ;;  %v1588_v48 = vadd.f32 %v1538_v32, %v3379_v63 }
 0x48b   :  { %v1587_v51 = vadd.f32 %v1533_v8, %v3383_v29  ;;  %v2570_v12 = vpop.f32.mrb[92].mxu0 }
 0x48c   :  { %v1548_v50 = vadd.f32 %v2570_v12, %v3519_v37  ;;  %v1542_v43 = vpop.f32.mrb[93].mxu0 }
 0x48d   :  { %v1543_v17 = vadd.f32 %v3519_v37, %v1542_v43  ;;  %2645 = vmatprep.mubr.f32.mxu1 %v1587_v51 }
 0x48e   :  { %2646 = vmatmul.mubr.f32.gmra.mrb[84].mxu1 %v1588_v48  ;;  %v1590_v23 = vadd.f32 %v1548_v50, %v3389_v5 }
 0x48f   :  { %v1589_v57 = vadd.f32 %v1543_v17, %v3393_v47  ;;  %v2573_v9 = vpop.f32.mrb[94].mxu0  ;;  %v3588_v47 = vld [vmem:[%s3643_s6] ss:$0 sm:$0xff]  ;;  %s2885_s6 = smov [#allocation5]  }
 0x490   :  { %v1558_v22 = vadd.f32 %v2573_v9, %v3519_v37  ;;  %v1552_v10 = vpop.f32.mrb[95].mxu0  ;;  %s1878_s25 = sshll.u32 %s2885_s6, 4  ;;  %s1879_s25 = int_to_ptr.vmem [resolvable:$true] %s1878_s25 }
 0x491   :  { %v1553_v29 = vadd.f32 %v3519_v37, %v1552_v10  ;;  %2648 = vmatprep.mubr.f32.mxu1 %v1589_v57  ;;  %s2856_s26 = scalar_lea.vmem %s1879_s25, 4096  ;;  %p2861_p9 = scmp.lt.s32.totalorder %s1879_s25, %s1879_s25 }
 0x492   :  { %2649 = vmatmul.mubr.f32.gmra.mrb[86].mxu1 %v1590_v23  ;;  %v1592_v52 = vadd.f32 %v1558_v22, %v3399_v11  ;;  %p2857_p8 = scmp.ne.s32.totalorder %s1879_s25, %s2856_s26  ;;  %p2862_p10 = scmp.lt.s32.totalorder %s2856_s26, %s2856_s26 }
 0x493   :  { %v1591_v63 = vadd.f32 %v1553_v29, %v3403_v1 }
 0x494   :  { %p2863_p11 = por %p2862_p10, %p2861_p9 }
 0x495   :  { %2651 = vmatprep.mubr.f32.mxu1 %v1591_v63 }
 0x496   :  { %2652 = vmatmul.mubr.f32.gmra.mrb[88].mxu1 %v1592_v52  ;;  %p2864_p12 = pnand %p2863_p11, %p2857_p8 }
 0x52d   :  { %v2608_v54 = vpop.f32.mrb[96].mxu0 }
 0x52e   :  { %v1688_v5 = vadd.f32 %v2608_v54, %v3588_v47  ;;  %v1682_v2 = vpop.f32.mrb[97].mxu0 }
 0x52f   :  { %v1683_v38 = vadd.f32 %v3588_v47, %v1682_v2 }
 0x530   :  { %1842 = vst [vmem:[#allocation5 + $0x8] sm:$0xff] %v1688_v5 }
 0x531   :  { %1841 = vst [vmem:[#allocation5] sm:$0xff] %v1683_v38  ;;  %v2611_v37 = vpop.f32.mrb[98].mxu0 }
 0x532   :  { %v1698_v1 = vadd.f32 %v2611_v37, %v3588_v47  ;;  %v1692_v35 = vpop.f32.mrb[99].mxu0 }
 0x533   :  { %v1693_v11 = vadd.f32 %v3588_v47, %v1692_v35 }
 0x534   :  { %1844 = vst [vmem:[#allocation5 + $0x18] sm:$0xff] %v1698_v1 }
 0x535   :  { %1843 = vst [vmem:[#allocation5 + $0x10] sm:$0xff] %v1693_v11  ;;  %v2614_v40 = vpop.f32.mrb[100].mxu0 }
 0x536   :  { %v1708_v60 = vadd.f32 %v2614_v40, %v3588_v47  ;;  %v1702_v24 = vpop.f32.mrb[101].mxu0 }
 0x537   :  { %v1703_v0 = vadd.f32 %v3588_v47, %v1702_v24 }
 0x538   :  { %1846 = vst [vmem:[#allocation5 + $0x28] sm:$0xff] %v1708_v60 }
 0x539   :  { %1845 = vst [vmem:[#allocation5 + $0x20] sm:$0xff] %v1703_v0  ;;  %v2617_v59 = vpop.f32.mrb[64].mxu1 }
 0x53a   :  { %v1718_v58 = vadd.f32 %v2617_v59, %v3588_v47  ;;  %v1712_v49 = vpop.f32.mrb[65].mxu1 }
 0x53b   :  { %v1713_v18 = vadd.f32 %v3588_v47, %v1712_v49 }
 0x53c   :  { %1848 = vst [vmem:[#allocation5 + $0x38] sm:$0xff] %v1718_v58 }
 0x53d   :  { %1847 = vst [vmem:[#allocation5 + $0x30] sm:$0xff] %v1713_v18  ;;  %v2620_v44 = vpop.f32.mrb[66].mxu1 }
 0x53e   :  { %v1728_v13 = vadd.f32 %v2620_v44, %v3588_v47  ;;  %v1722_v21 = vpop.f32.mrb[67].mxu1 }
 0x53f   :  { %v1723_v19 = vadd.f32 %v3588_v47, %v1722_v21 }
 0x540   :  { %1850 = vst [vmem:[#allocation5 + $0x48] sm:$0xff] %v1728_v13 }
 0x541   :  { %1849 = vst [vmem:[#allocation5 + $0x40] sm:$0xff] %v1723_v19  ;;  %v2623_v20 = vpop.f32.mrb[68].mxu1 }
 0x542   :  { %v1738_v55 = vadd.f32 %v2623_v20, %v3588_v47  ;;  %v1732_v28 = vpop.f32.mrb[69].mxu1 }
 0x543   :  { %v1733_v16 = vadd.f32 %v3588_v47, %v1732_v28 }
 0x544   :  { %1852 = vst [vmem:[#allocation5 + $0x58] sm:$0xff] %v1738_v55 }
 0x545   :  { %1851 = vst [vmem:[#allocation5 + $0x50] sm:$0xff] %v1733_v16  ;;  %v2626_v14 = vpop.f32.mrb[70].mxu1 }
 0x546   :  { %v1748_v27 = vadd.f32 %v2626_v14, %v3588_v47  ;;  %v1742_v31 = vpop.f32.mrb[71].mxu1 }
 0x547   :  { %v1743_v61 = vadd.f32 %v3588_v47, %v1742_v31 }
 0x548   :  { %1854 = vst [vmem:[#allocation5 + $0x68] sm:$0xff] %v1748_v27 }
 0x549   :  { %1853 = vst [vmem:[#allocation5 + $0x60] sm:$0xff] %v1743_v61  ;;  %v2629_v34 = vpop.f32.mrb[72].mxu1 }
 0x54a   :  { %v1758_v56 = vadd.f32 %v2629_v34, %v3588_v47  ;;  %v1752_v26 = vpop.f32.mrb[73].mxu1 }
 0x54b   :  { %v1753_v33 = vadd.f32 %v3588_v47, %v1752_v26 }
 0x54c   :  { %1856 = vst [vmem:[#allocation5 + $0x78] sm:$0xff] %v1758_v56 }
 0x54d   :  { %1855 = vst [vmem:[#allocation5 + $0x70] sm:$0xff] %v1753_v33  ;;  %v2632_v53 = vpop.f32.mrb[74].mxu1 }
 0x54e   :  { %v1768_v4 = vadd.f32 %v2632_v53, %v3588_v47  ;;  %v1762_v36 = vpop.f32.mrb[75].mxu1 }
 0x54f   :  { %v1763_v30 = vadd.f32 %v3588_v47, %v1762_v36 }
 0x550   :  { %1858 = vst [vmem:[#allocation5 + $0x88] sm:$0xff] %v1768_v4 }
 0x551   :  { %1857 = vst [vmem:[#allocation5 + $0x80] sm:$0xff] %v1763_v30  ;;  %v2635_v41 = vpop.f32.mrb[76].mxu1 }
 0x552   :  { %v1778_v39 = vadd.f32 %v2635_v41, %v3588_v47  ;;  %v1772_v3 = vpop.f32.mrb[77].mxu1 }
 0x553   :  { %v1773_v7 = vadd.f32 %v3588_v47, %v1772_v3 }
 0x554   :  { %1860 = vst [vmem:[#allocation5 + $0x98] sm:$0xff] %v1778_v39 }
 0x555   :  { %1859 = vst [vmem:[#allocation5 + $0x90] sm:$0xff] %v1773_v7  ;;  %v2638_v6 = vpop.f32.mrb[78].mxu1 }
 0x556   :  { %v1788_v42 = vadd.f32 %v2638_v6, %v3588_v47  ;;  %v1782_v62 = vpop.f32.mrb[79].mxu1 }
 0x557   :  { %v1783_v45 = vadd.f32 %v3588_v47, %v1782_v62 }
 0x558   :  { %1862 = vst [vmem:[#allocation5 + $0xa8] sm:$0xff] %v1788_v42 }
 0x559   :  { %1861 = vst [vmem:[#allocation5 + $0xa0] sm:$0xff] %v1783_v45  ;;  %v2641_v15 = vpop.f32.mrb[80].mxu1 }
 0x55a   :  { %v1798_v46 = vadd.f32 %v2641_v15, %v3588_v47  ;;  %v1792_v32 = vpop.f32.mrb[81].mxu1 }
 0x55b   :  { %v1793_v25 = vadd.f32 %v3588_v47, %v1792_v32 }
 0x55c   :  { %1864 = vst [vmem:[#allocation5 + $0xb8] sm:$0xff] %v1798_v46 }
 0x55d   :  { %1863 = vst [vmem:[#allocation5 + $0xb0] sm:$0xff] %v1793_v25  ;;  %v2644_v8 = vpop.f32.mrb[82].mxu1 }
 0x55e   :  { %v1808_v51 = vadd.f32 %v2644_v8, %v3588_v47  ;;  %v1802_v12 = vpop.f32.mrb[83].mxu1 }
 0x55f   :  { %v1803_v48 = vadd.f32 %v3588_v47, %v1802_v12 }
 0x560   :  { %1866 = vst [vmem:[#allocation5 + $0xc8] sm:$0xff] %v1808_v51 }
 0x561   :  { %1865 = vst [vmem:[#allocation5 + $0xc0] sm:$0xff] %v1803_v48  ;;  %v2647_v50 = vpop.f32.mrb[84].mxu1 }
 0x562   :  { %v1818_v43 = vadd.f32 %v2647_v50, %v3588_v47  ;;  %v1812_v17 = vpop.f32.mrb[85].mxu1 }
 0x563   :  { %v1813_v57 = vadd.f32 %v3588_v47, %v1812_v17 }
 0x564   :  { %1868 = vst [vmem:[#allocation5 + $0xd8] sm:$0xff] %v1818_v43 }
 0x565   :  { %1867 = vst [vmem:[#allocation5 + $0xd0] sm:$0xff] %v1813_v57  ;;  %v2650_v9 = vpop.f32.mrb[86].mxu1 }
 0x566   :  { %v1828_v23 = vadd.f32 %v2650_v9, %v3588_v47  ;;  %v1822_v22 = vpop.f32.mrb[87].mxu1 }
 0x567   :  { %v1823_v10 = vadd.f32 %v3588_v47, %v1822_v22 }
 0x568   :  { %1870 = vst [vmem:[#allocation5 + $0xe8] sm:$0xff] %v1828_v23 }
 0x569   :  { %1869 = vst [vmem:[#allocation5 + $0xe0] sm:$0xff] %v1823_v10  ;;  %v2653_v29 = vpop.f32.mrb[88].mxu1 }
 0x56a   :  { %v1838_v63 = vadd.f32 %v2653_v29, %v3588_v47  ;;  %v1832_v52 = vpop.f32.mrb[89].mxu1 }
 0x56b   :  { %v1833_v54 = vadd.f32 %v3588_v47, %v1832_v52 }
 0x56c   :  { %1872 = vst [vmem:[#allocation5 + $0xf8] sm:$0xff] %v1838_v63 }
 0x56d   :  { %1871 = vst [vmem:[#allocation5 + $0xf0] sm:$0xff] %v1833_v54 }
 0x56e   :  { %2867 = shalt.err (!%p2864_p12)
}
 0x56f   :  { %s2868_s29 = scalar_lea.hbm %s3644_s7, 4096 }
 0x570   :  { %p2869_p13 = scmp.ne.s32.totalorder %s3644_s7, %s2868_s29  ;;  %p2872_p0 = scmp.lt.u32.totalorder %s2868_s29, %s3644_s7 }
 0x572   :  { %p2874_p1 = pnand %p2872_p0, %p2869_p13 }
 0x574   :  { %2877 = shalt.err (!%p2874_p1)
}
 0x575   :  { %1884 = dma.vmem_to_hbm [thread:$0]  %s1879_s25, 4096, %s3644_s7, [#allocation4], %s2883_s11, %s2883_s11, %s2884_s12  }
 0x576   :  { %2880 = dma.done.wait [#allocation4], 4096  }
 0x577   :  { %2881 = vsyncadd [#allocation4], 4294963200 }
 0x578   :  { %1888 = vsyncpa [#allocation3], 1 }
 0x579   :  { %1889 = vsyncpa [#allocation4], 1 }

</bundles_post_ra>
